<compile_context>
chip_gen: v5e
topology: v5e:2x2
jax: 0.10.0
libtpu: 0.0.40
codegen_flags: <defaults>
</compile_context>

<pallas_src>
import functools

import jax
import jax.numpy as jnp
from jax.experimental import pallas as pl
from jax.experimental.pallas import tpu as pltpu


# --------------------------------------------------------------------------
# Kernels
# --------------------------------------------------------------------------
def _ffn_kernel(x_ref, w1_ref, w2_ref, o_ref, *, eps):
    """Fused FFN + residual + LayerNorm, weights fully VMEM-resident."""
    x = x_ref[...]                                   # (TM, D)
    w1 = w1_ref[...]                                 # (D, F)   bf16, resident
    w2 = w2_ref[...]                                 # (F, D)   bf16, resident

    h = jnp.dot(x.astype(w1.dtype), w1, preferred_element_type=jnp.float32)
    h = jnp.maximum(h, 0.0)
    out = jnp.dot(h.astype(w2.dtype), w2, preferred_element_type=jnp.float32)

    out = out + x.astype(jnp.float32)                # residual
    mean = jnp.mean(out, axis=-1, keepdims=True)
    cen = out - mean
    var = jnp.mean(cen * cen, axis=-1, keepdims=True)
    inv = jax.lax.rsqrt(var + eps)                   # EUP slot, frees VALU
    o_ref[...] = (cen * inv).astype(o_ref.dtype)


def _ffn_kernel_ftiled(x_ref, w1_ref, w2_ref, o_ref, acc_ref, *, eps):
    """d_ff-tiled variant: accumulate partial second matmul across F tiles."""
    f = pl.program_id(1)

    @pl.when(f == 0)
    def _():
        acc_ref[...] = jnp.zeros_like(acc_ref)

    x = x_ref[...]                                   # (TM, D)
    w1 = w1_ref[...]                                 # (D, TF)
    w2 = w2_ref[...]                                 # (TF, D)

    h = jnp.dot(x.astype(w1.dtype), w1, preferred_element_type=jnp.float32)
    h = jnp.maximum(h, 0.0)
    acc_ref[...] += jnp.dot(h.astype(w2.dtype), w2,
                            preferred_element_type=jnp.float32)

    @pl.when(f == pl.num_programs(1) - 1)
    def _():
        out = acc_ref[...] + x.astype(jnp.float32)   # residual
        mean = jnp.mean(out, axis=-1, keepdims=True)
        cen = out - mean
        var = jnp.mean(cen * cen, axis=-1, keepdims=True)
        inv = jax.lax.rsqrt(var + eps)
        o_ref[...] = (cen * inv).astype(o_ref.dtype)


# --------------------------------------------------------------------------
# Wrapper
# --------------------------------------------------------------------------
def _round_up(x, m):
    return ((x + m - 1) // m) * m


def _cdiv(a, b):
    return -(-a // b)


def _vmem_capacity_bytes():
    try:
        info = pltpu.get_tpu_info()
        cap = getattr(info, "vmem_capacity_bytes", None)
        if cap:
            return int(cap)
    except Exception:
        pass
    return 64 * 1024 * 1024      # conservative: v7x per-TensorCore VMEM


def poswise_feed_forward(x, w1, w2, *, eps=1e-5, block_rows=2048, block_ff=512,
                         weight_dtype=jnp.bfloat16, force_f_tiled=False):
    """x: [B, S, d_model], w1: [d_model, d_ff], w2: [d_ff, d_model]."""
    B, S, D = x.shape
    Din, F = w1.shape
    assert Din == D and w2.shape == (F, D)

    rows = B * S
    xf = x.reshape(rows, D)
    w1c = w1.astype(weight_dtype)
    w2c = w2.astype(weight_dtype)

    x_bytes = jnp.dtype(x.dtype).itemsize
    w_bytes = jnp.dtype(weight_dtype).itemsize
    # Sub-32-bit activations pack along sublanes -> 16-row alignment for bf16.
    align = max(8, 32 // x_bytes)

    capacity = _vmem_capacity_bytes()
    budget = (capacity * 3) // 4        # leave headroom for Mosaic scratch

    # ---- weight residency guard ------------------------------------------
    resident_weight_bytes = 2 * D * F * w_bytes          # W1 + W2, one buffer
    f_tiled = force_f_tiled or (resident_weight_bytes > capacity // 3)

    if f_tiled:
        tf = max(128, _round_up(min(block_ff, F), 128))
        Fp = _round_up(F, tf)
        if Fp != F:                                       # zero-pad d_ff tiles
            w1c = jnp.pad(w1c, ((0, 0), (0, Fp - F)))
            w2c = jnp.pad(w2c, ((0, Fp - F), (0, 0)))
    else:
        tf = F
        Fp = F

    # ---- row tile: as large as the VMEM budget allows ---------------------
    tm = max(align, _round_up(min(block_rows, _round_up(rows, align)), align))

    def vmem_needed(tm_):
        io = 2 * 2 * tm_ * D * x_bytes                    # x & out, double-buf
        if f_tiled:
            w = 2 * 2 * D * tf * w_bytes                  # W1/W2 tiles, 2-buf
            inter = tm_ * (tf + 3 * D) * 4                # h + acc + LN temps
        else:
            w = resident_weight_bytes                     # single-buffered
            inter = tm_ * (F + 2 * D) * 4                 # h + out/cen
        return io + w + inter

    while tm > align and vmem_needed(tm) > budget:
        tm = max(align, _round_up(tm // 2, align))

    # Keep a handful of grid steps per core so the pipeline has work to
    # overlap, but never shrink below 512 rows (big tiles dominate).
    while tm >= 1024 and _cdiv(rows, tm) < 8:
        tm //= 2

    padded_rows = _round_up(rows, tm)
    if padded_rows != rows:
        xf = jnp.pad(xf, ((0, padded_rows - rows), (0, 0)))

    vmem_limit = int(min(budget, max(vmem_needed(tm) + (8 << 20), 32 << 20)))

    cost = pl.CostEstimate(
        flops=4 * rows * D * F + 6 * rows * D,
        transcendentals=rows,
        bytes_accessed=2 * rows * D * x_bytes + 2 * D * F * w_bytes,
    )

    if not f_tiled:
        def build(weight_mode):
            wkw = {} if weight_mode is None else {"pipeline_mode": weight_mode}
            return pl.pallas_call(
                functools.partial(_ffn_kernel, eps=eps),
                grid=(padded_rows // tm,),
                in_specs=[
                    pl.BlockSpec((tm, D), lambda i: (i, 0)),         # rows
                    pl.BlockSpec((D, F), lambda i: (0, 0), **wkw),   # W1
                    pl.BlockSpec((F, D), lambda i: (0, 0), **wkw),   # W2
                ],
                out_specs=pl.BlockSpec((tm, D), lambda i: (i, 0)),
                out_shape=jax.ShapeDtypeStruct((padded_rows, D), x.dtype),
                compiler_params=pltpu.CompilerParams(
                    dimension_semantics=("parallel",),
                    vmem_limit_bytes=vmem_limit),
                cost_estimate=cost,
            )

        try:
            out = build(pl.Buffered(1))(xf, w1c, w2c)
        except Exception:
            # TODO(synk): drop fallback once single-buffered (Buffered(1))
            # resident weights are guaranteed by the deployed jax version.
            out = build(None)(xf, w1c, w2c)
    else:
        out = pl.pallas_call(
            functools.partial(_ffn_kernel_ftiled, eps=eps),
            grid=(padded_rows // tm, Fp // tf),
            in_specs=[
                pl.BlockSpec((tm, D), lambda i, f: (i, 0)),           # rows
                pl.BlockSpec((D, tf), lambda i, f: (0, f)),           # W1 tile
                pl.BlockSpec((tf, D), lambda i, f: (f, 0)),           # W2 tile
            ],
            out_specs=pl.BlockSpec((tm, D), lambda i, f: (i, 0)),
            out_shape=jax.ShapeDtypeStruct((padded_rows, D), x.dtype),
            scratch_shapes=[pltpu.VMEM((tm, D), jnp.float32)],
            compiler_params=pltpu.CompilerParams(
                dimension_semantics=("parallel", "arbitrary"),
                vmem_limit_bytes=vmem_limit),
            cost_estimate=cost,
        )(xf, w1c, w2c)

    return out[:rows].reshape(B, S, D)


# --------------------------------------------------------------------------
# References
# --------------------------------------------------------------------------
def _reference_f32(x, w1, w2, eps=1e-5):
    h = jnp.maximum(jnp.einsum("bsd,df->bsf", x, w1), 0.0)
    out = jnp.einsum("bsf,fd->bsd", h, w2) + x
    mean = jnp.mean(out, axis=-1, keepdims=True)
    var = jnp.mean((out - mean) ** 2, axis=-1, keepdims=True)
    return (out - mean) * jax.lax.rsqrt(var + eps)


def _reference_matched(x, w1b, w2b, eps=1e-5):
    """Matches the kernel's bf16-operand / f32-accumulate matmul precision."""
    xb = x.astype(jnp.bfloat16)
    h = jnp.einsum("bsd,df->bsf", xb, w1b, preferred_element_type=jnp.float32)
    h = jnp.maximum(h, 0.0)
    out = jnp.einsum("bsf,fd->bsd", h.astype(jnp.bfloat16), w2b,
                     preferred_element_type=jnp.float32)
    out = out + x.astype(jnp.float32)
    mean = jnp.mean(out, axis=-1, keepdims=True)
    var = jnp.mean((out - mean) ** 2, axis=-1, keepdims=True)
    return (out - mean) * jax.lax.rsqrt(var + eps)


# --------------------------------------------------------------------------
# Demo / self-check
# --------------------------------------------------------------------------
if __name__ == "__main__":
    key = jax.random.PRNGKey(0)
    B, S, D_MODEL, D_FF = 2, 64, 128, 256

    kx, k1, k2 = jax.random.split(key, 3)
    x = jax.random.normal(kx, (B, S, D_MODEL), dtype=jnp.float32)
    w1 = jax.random.normal(k1, (D_MODEL, D_FF), dtype=jnp.float32) * (1.0 / D_MODEL ** 0.5)
    w2 = jax.random.normal(k2, (D_FF, D_MODEL), dtype=jnp.float32) * (1.0 / D_FF ** 0.5)

    # Resident-weights path (default, large row tile).
    y = poswise_feed_forward(x, w1, w2)
    jax.block_until_ready(y)

    # d_ff-tiled accumulator path (forced, to exercise the production-size
    # weight guard on small shapes).
    y_ft = poswise_feed_forward(x, w1, w2, force_f_tiled=True, block_ff=128)
    jax.block_until_ready(y_ft)

    y_f32 = _reference_f32(x, w1, w2)
    y_mat = _reference_matched(x, w1.astype(jnp.bfloat16), w2.astype(jnp.bfloat16))

    assert y.shape == (B, S, D_MODEL)
    assert bool(jnp.all(jnp.isfinite(y)))
    assert bool(jnp.all(jnp.isfinite(y_ft)))

    # Tight check against a precision-matched reference (bf16 MXU operands,
    # f32 accumulation) and a looser check against the pure-f32 module math.
    assert jnp.allclose(y, y_mat, atol=3e-3, rtol=3e-3), float(
        jnp.max(jnp.abs(y - y_mat)))
    assert jnp.allclose(y, y_f32, atol=3e-2, rtol=3e-2), float(
        jnp.max(jnp.abs(y - y_f32)))
    assert jnp.allclose(y_ft, y, atol=2e-3, rtol=2e-3), float(
        jnp.max(jnp.abs(y_ft - y)))

    print("KERNEL_OK")
</pallas_src>

<mosaic_0001>
module attributes {stable_mosaic.version = 11 : i64} {
  func.func @_ffn_kernel(%arg0: i32, %arg1: memref<128x128xf32, #tpu.memory_space<vmem>>, %arg2: memref<128x256xbf16, #tpu.memory_space<vmem>>, %arg3: memref<256x128xbf16, #tpu.memory_space<vmem>>, %arg4: memref<128x128xf32, #tpu.memory_space<vmem>>) attributes {dimension_semantics = [#tpu.dimension_semantics<parallel>], iteration_bounds = array<i64: 1>, scalar_prefetch = 0 : i64, scratch_operands = 0 : i64, tpu.core_type = #tpu.core_type<tc>, window_params = [{transform_indices = @transform_0, window_bounds = array<i64: 128, 128>}, {pipeline_mode = #tpu.pipeline_mode<synchronous>, transform_indices = @transform_1, window_bounds = array<i64: 128, 256>}, {pipeline_mode = #tpu.pipeline_mode<synchronous>, transform_indices = @transform_2, window_bounds = array<i64: 256, 128>}, {transform_indices = @transform_3, window_bounds = array<i64: 128, 128>}]} {
    %c0 = arith.constant 0 : index
    %c0_0 = arith.constant 0 : index
    %0 = vector.load %arg1[%c0, %c0_0] : memref<128x128xf32, #tpu.memory_space<vmem>>, vector<128x128xf32>
    %c0_1 = arith.constant 0 : index
    %c0_2 = arith.constant 0 : index
    %1 = vector.load %arg2[%c0_1, %c0_2] : memref<128x256xbf16, #tpu.memory_space<vmem>>, vector<128x256xbf16>
    %c0_3 = arith.constant 0 : index
    %c0_4 = arith.constant 0 : index
    %2 = vector.load %arg3[%c0_3, %c0_4] : memref<256x128xbf16, #tpu.memory_space<vmem>>, vector<256x128xbf16>
    %3 = arith.truncf %0 : vector<128x128xf32> to vector<128x128xbf16>
    %cst = arith.constant dense<0.000000e+00> : vector<128x256xf32>
    %4 = tpu.matmul %3, %1, %cst {dimension_numbers = #tpu.dot_dimension_numbers<[1], [0], [0], [1], [0, 0, 1, 1], [], []>} : vector<128x128xbf16>, vector<128x256xbf16>, vector<128x256xf32> -> vector<128x256xf32>
    %cst_5 = arith.constant 0.000000e+00 : f32
    %5 = vector.broadcast %cst_5 : f32 to vector<128x256xf32>
    %6 = arith.maximumf %4, %5 : vector<128x256xf32>
    %7 = arith.truncf %6 : vector<128x256xf32> to vector<128x256xbf16>
    %cst_6 = arith.constant dense<0.000000e+00> : vector<128x128xf32>
    %8 = tpu.matmul %7, %2, %cst_6 {dimension_numbers = #tpu.dot_dimension_numbers<[1], [0], [0], [1], [0, 0, 1, 1], [], []>} : vector<128x256xbf16>, vector<256x128xbf16>, vector<128x128xf32> -> vector<128x128xf32>
    %9 = arith.addf %8, %0 : vector<128x128xf32>
    %cst_7 = arith.constant dense<0.000000e+00> : vector<128xf32>
    %10 = vector.multi_reduction <add>, %9, %cst_7 [1] : vector<128x128xf32> to vector<128xf32>
    %11 = vector.shape_cast %10 : vector<128xf32> to vector<128x1xf32>
    %cst_8 = arith.constant 1.280000e+02 : f32
    %12 = vector.broadcast %cst_8 : f32 to vector<128x1xf32>
    %13 = arith.divf %11, %12 : vector<128x1xf32>
    %14 = vector.broadcast %13 : vector<128x1xf32> to vector<128x128xf32>
    %15 = arith.subf %9, %14 : vector<128x128xf32>
    %16 = arith.mulf %15, %15 : vector<128x128xf32>
    %cst_9 = arith.constant dense<0.000000e+00> : vector<128xf32>
    %17 = vector.multi_reduction <add>, %16, %cst_9 [1] : vector<128x128xf32> to vector<128xf32>
    %18 = vector.shape_cast %17 : vector<128xf32> to vector<128x1xf32>
    %cst_10 = arith.constant 1.280000e+02 : f32
    %19 = vector.broadcast %cst_10 : f32 to vector<128x1xf32>
    %20 = arith.divf %18, %19 : vector<128x1xf32>
    %cst_11 = arith.constant 9.99999974E-6 : f32
    %21 = vector.broadcast %cst_11 : f32 to vector<128x1xf32>
    %22 = arith.addf %20, %21 : vector<128x1xf32>
    %23 = math.rsqrt %22 : vector<128x1xf32>
    %24 = vector.broadcast %23 : vector<128x1xf32> to vector<128x128xf32>
    %25 = arith.mulf %15, %24 : vector<128x128xf32>
    %c0_12 = arith.constant 0 : index
    %c0_13 = arith.constant 0 : index
    %26 = vector.load %arg4[%c0_12, %c0_13] : memref<128x128xf32, #tpu.memory_space<vmem>>, vector<128x128xf32>
    tpu.vector_store %arg4[%c0_12, %c0_13], %25 {strides = array<i32>} : memref<128x128xf32, #tpu.memory_space<vmem>>, vector<128x128xf32>,
    return
  }
  func.func @transform_0(%arg0: i32) -> (i32, i32) {
    %c0_i32 = arith.constant 0 : i32
    %c0_i32_0 = arith.constant 0 : i32
    return %arg0, %c0_i32 : i32, i32
  }
  func.func @transform_1(%arg0: i32) -> (i32, i32) {
    %c0_i32 = arith.constant 0 : i32
    %c0_i32_0 = arith.constant 0 : i32
    %c0_i32_1 = arith.constant 0 : i32
    return %c0_i32, %c0_i32_0 : i32, i32
  }
  func.func @transform_2(%arg0: i32) -> (i32, i32) {
    %c0_i32 = arith.constant 0 : i32
    %c0_i32_0 = arith.constant 0 : i32
    %c0_i32_1 = arith.constant 0 : i32
    return %c0_i32, %c0_i32_0 : i32, i32
  }
  func.func @transform_3(%arg0: i32) -> (i32, i32) {
    %c0_i32 = arith.constant 0 : i32
    %c0_i32_0 = arith.constant 0 : i32
    return %arg0, %c0_i32 : i32, i32
  }
}

module attributes {stable_mosaic.version = 11 : i64} {
  func.func @_ffn_kernel(%arg0: i32, %arg1: memref<128x128xf32, #tpu.memory_space<vmem>>, %arg2: memref<128x256xbf16, #tpu.memory_space<vmem>>, %arg3: memref<256x128xbf16, #tpu.memory_space<vmem>>, %arg4: memref<128x128xf32, #tpu.memory_space<vmem>>) attributes {dimension_semantics = [#tpu.dimension_semantics<parallel>], iteration_bounds = array<i64: 1>, scalar_prefetch = 0 : i64, scratch_operands = 0 : i64, tpu.core_type = #tpu.core_type<tc>, window_params = [{transform_indices = @transform_0, window_bounds = array<i64: 128, 128>}, {pipeline_mode = #tpu.pipeline_mode<synchronous>, transform_indices = @transform_1, window_bounds = array<i64: 128, 256>}, {pipeline_mode = #tpu.pipeline_mode<synchronous>, transform_indices = @transform_2, window_bounds = array<i64: 256, 128>}, {transform_indices = @transform_3, window_bounds = array<i64: 128, 128>}]} {
    %c0 = arith.constant 0 : index
    %c0_0 = arith.constant 0 : index
    %0 = vector.load %arg1[%c0, %c0_0] : memref<128x128xf32, #tpu.memory_space<vmem>>, vector<128x128xf32>
    %c0_1 = arith.constant 0 : index
    %c0_2 = arith.constant 0 : index
    %1 = vector.load %arg2[%c0_1, %c0_2] : memref<128x256xbf16, #tpu.memory_space<vmem>>, vector<128x256xbf16>
    %c0_3 = arith.constant 0 : index
    %c0_4 = arith.constant 0 : index
    %2 = vector.load %arg3[%c0_3, %c0_4] : memref<256x128xbf16, #tpu.memory_space<vmem>>, vector<256x128xbf16>
    %3 = arith.truncf %0 : vector<128x128xf32> to vector<128x128xbf16>
    %cst = arith.constant dense<0.000000e+00> : vector<128x256xf32>
    %4 = tpu.matmul %3, %1, %cst {dimension_numbers = #tpu.dot_dimension_numbers<[1], [0], [0], [1], [0, 0, 1, 1], [], []>} : vector<128x128xbf16>, vector<128x256xbf16>, vector<128x256xf32> -> vector<128x256xf32>
    %cst_5 = arith.constant 0.000000e+00 : f32
    %5 = vector.broadcast %cst_5 : f32 to vector<128x256xf32>
    %6 = arith.maximumf %4, %5 : vector<128x256xf32>
    %7 = arith.truncf %6 : vector<128x256xf32> to vector<128x256xbf16>
    %cst_6 = arith.constant dense<0.000000e+00> : vector<128x128xf32>
    %8 = tpu.matmul %7, %2, %cst_6 {dimension_numbers = #tpu.dot_dimension_numbers<[1], [0], [0], [1], [0, 0, 1, 1], [], []>} : vector<128x256xbf16>, vector<256x128xbf16>, vector<128x128xf32> -> vector<128x128xf32>
    %9 = arith.addf %8, %0 : vector<128x128xf32>
    %cst_7 = arith.constant dense<0.000000e+00> : vector<128xf32>
    %10 = vector.multi_reduction <add>, %9, %cst_7 [1] : vector<128x128xf32> to vector<128xf32>
    %11 = vector.shape_cast %10 : vector<128xf32> to vector<128x1xf32>
    %cst_8 = arith.constant 1.280000e+02 : f32
    %12 = vector.broadcast %cst_8 : f32 to vector<128x1xf32>
    %13 = arith.divf %11, %12 : vector<128x1xf32>
    %14 = vector.broadcast %13 : vector<128x1xf32> to vector<128x128xf32>
    %15 = arith.subf %9, %14 : vector<128x128xf32>
    %16 = arith.mulf %15, %15 : vector<128x128xf32>
    %cst_9 = arith.constant dense<0.000000e+00> : vector<128xf32>
    %17 = vector.multi_reduction <add>, %16, %cst_9 [1] : vector<128x128xf32> to vector<128xf32>
    %18 = vector.shape_cast %17 : vector<128xf32> to vector<128x1xf32>
    %cst_10 = arith.constant 1.280000e+02 : f32
    %19 = vector.broadcast %cst_10 : f32 to vector<128x1xf32>
    %20 = arith.divf %18, %19 : vector<128x1xf32>
    %cst_11 = arith.constant 9.99999974E-6 : f32
    %21 = vector.broadcast %cst_11 : f32 to vector<128x1xf32>
    %22 = arith.addf %20, %21 : vector<128x1xf32>
    %23 = math.rsqrt %22 : vector<128x1xf32>
    %24 = vector.broadcast %23 : vector<128x1xf32> to vector<128x128xf32>
    %25 = arith.mulf %15, %24 : vector<128x128xf32>
    %c0_12 = arith.constant 0 : index
    %c0_13 = arith.constant 0 : index
    %26 = vector.load %arg4[%c0_12, %c0_13] : memref<128x128xf32, #tpu.memory_space<vmem>>, vector<128x128xf32>
    tpu.vector_store %arg4[%c0_12, %c0_13], %25 {strides = array<i32>} : memref<128x128xf32, #tpu.memory_space<vmem>>, vector<128x128xf32>,
    return
  }
  func.func @transform_0(%arg0: i32) -> (i32, i32) {
    %c0_i32 = arith.constant 0 : i32
    %c0_i32_0 = arith.constant 0 : i32
    return %arg0, %c0_i32 : i32, i32
  }
  func.func @transform_1(%arg0: i32) -> (i32, i32) {
    %c0_i32 = arith.constant 0 : i32
    %c0_i32_0 = arith.constant 0 : i32
    %c0_i32_1 = arith.constant 0 : i32
    return %c0_i32, %c0_i32_0 : i32, i32
  }
  func.func @transform_2(%arg0: i32) -> (i32, i32) {
    %c0_i32 = arith.constant 0 : i32
    %c0_i32_0 = arith.constant 0 : i32
    %c0_i32_1 = arith.constant 0 : i32
    return %c0_i32, %c0_i32_0 : i32, i32
  }
  func.func @transform_3(%arg0: i32) -> (i32, i32) {
    %c0_i32 = arith.constant 0 : i32
    %c0_i32_0 = arith.constant 0 : i32
    return %arg0, %c0_i32 : i32, i32
  }
}

</mosaic_0001>

<bundles_post_ra>
// kernel: tpu_custom_call.1
= control target key start
LH: loop header
LB: loop body
LE: loop exit
PB: predicated region body
PF: predicated region fallthrough
CT: control target
= control target key end

     0   :  { %8 = vsyncpa [#allocation3], 0  ;;  %s1514_s0 = inlined_call_operand.hbm [shape: f32[128,128], index: 0, kind: input, shape index: {}]   ;;  %s1515_s1 = inlined_call_operand.hbm [shape: bf16[128,256], index: 1, kind: input, shape index: {}]   ;;  %s1516_s2 = inlined_call_operand.hbm [shape: bf16[256,128], index: 2, kind: input, shape index: {}]   ;;  %s1517_s3 = inlined_call_operand.hbm [shape: f32[128,128], index: 3, kind: output, shape index: {}]  }
   0x1   :  { %9 = vsyncpa [#allocation6], 0 }
   0x2   :  { %10 = vsyncpa [#allocation4], 0  ;;  %s28_s14 = sshll.u32 %s1515_s1, 4  ;;  %s1222_s15 = smov [#allocation5]   ;;  %s29_s14 = int_to_ptr.hbm [resolvable:$true] %s28_s14 }
   0x3   :  { %s30_s16 = sshll.u32 %s1222_s15, 4  ;;  %s15_s19 = sshll.u32 %s1514_s0, 4  ;;  %s31_s16 = int_to_ptr.vmem [resolvable:$true] %s30_s16  ;;  %s16_s19 = int_to_ptr.hbm [resolvable:$true] %s15_s19 }
   0x4   :  { %s1223_s20 = smov 128   ;;  %s1224_s21 = smov 8  }
   0x5   :  { %36 = dma.hbm_to_vmem [thread:$0]  %s29_s14, 2048, %s31_s16, [#allocation6], %s1223_s20, %s1223_s20, %s1224_s21  }
   0x6   :  { %s1225_s22 = smov [#allocation2]   ;;  %s41_s1 = sshll.u32 %s1516_s2, 4  ;;  %s42_s1 = int_to_ptr.hbm [resolvable:$true] %s41_s1 }
   0x7   :  { %s17_s23 = sshll.u32 %s1225_s22, 4  ;;  %s1226_s0 = smov [#allocation7]   ;;  %s18_s23 = int_to_ptr.vmem [resolvable:$true] %s17_s23 }
   0x8   :  { %23 = dma.hbm_to_vmem [thread:$0]  %s16_s19, 2048, %s18_s23, [#allocation3], %s1223_s20, %s1223_s20, %s1224_s21  }
   0x9   :  { %s43_s26 = sshll.u32 %s1226_s0, 4  ;;  %s1227_s27 = smov 64   ;;  %s44_s26 = int_to_ptr.vmem [resolvable:$true] %s43_s26 }
   0xa   :  { %s1228_s28 = smov 4  }
   0xb   :  { %49 = dma.hbm_to_vmem [thread:$0]  %s42_s1, 2048, %s44_s26, [#allocation6], %s1227_s27, %s1227_s27, %s1228_s28  }
   0xc   :  { %1216 = dma.done.wait [#allocation3], 2048  }
   0xd   :  { %1217 = vsyncadd [#allocation3], 4294965248 }
   0xe   :  { %1218 = dma.done.wait [#allocation6], 4096  }
   0xf   :  { %1219 = vsyncadd [#allocation6], 4294963200  ;;  %v975_v0 = vld [vmem:[#allocation5 + $0x70] sm:$0xf]  ;;  %v1060_v1 = vld [vmem:[#allocation5 + $0x74] sm:$0xf0] }
  0x10   :  { %v1059_v2 = vld [vmem:[#allocation5 + $0x74] sm:$0xf]  ;;  %v976_v3 = vor.u32 %v1060_v1, %v975_v0  ;;  %v977_v4 = vld [vmem:[#allocation5 + $0x78] sm:$0xf0]  ;;  %v967_v5 = vld [vmem:[#allocation5 + $0x60] sm:$0xf] }
  0x11   :  { %v1058_v6 = vld [vmem:[#allocation5 + $0x64] sm:$0xf0]  ;;  %v980_v7 = vor.u32 %v1059_v2, %v977_v4  ;;  %v1057_v8 = vld [vmem:[#allocation5 + $0x64] sm:$0xf]  ;;  %v969_v9 = vld [vmem:[#allocation5 + $0x68] sm:$0xf0] }
  0x12   :  { %214 = vmatpush.bf16.msra.mxu0 %v976_v3  ;;  %v968_v10 = vor.u32 %v1058_v6, %v967_v5  ;;  %v972_v11 = vor.u32 %v1057_v8, %v969_v9  ;;  %v959_v12 = vld [vmem:[#allocation5 + $0x50] sm:$0xf]  ;;  %v1056_v13 = vld [vmem:[#allocation5 + $0x54] sm:$0xf0]  ;;  %v1055_v14 = vld [vmem:[#allocation5 + $0x54] sm:$0xf] }
  0x13   :  { %263 = vmatpush.bf16.msra.mxu1 %v980_v7  ;;  %v961_v15 = vld [vmem:[#allocation5 + $0x58] sm:$0xf0]  ;;  %v960_v16 = vor.u32 %v1056_v13, %v959_v12  ;;  %v951_v18 = vld [vmem:[#allocation5 + $0x40] sm:$0xf]  ;;  %v1054_v19 = vld [vmem:[#allocation5 + $0x44] sm:$0xf0] }
  0x14   :  { %v964_v17 = vor.u32 %v1055_v14, %v961_v15  ;;  %v1053_v20 = vld [vmem:[#allocation5 + $0x44] sm:$0xf]  ;;  %v953_v21 = vld [vmem:[#allocation5 + $0x48] sm:$0xf0]  ;;  %v952_v22 = vor.u32 %v1054_v19, %v951_v18  ;;  %v943_v24 = vld [vmem:[#allocation5 + $0x30] sm:$0xf] }
  0x15   :  { %v956_v23 = vor.u32 %v1053_v20, %v953_v21  ;;  %v1052_v25 = vld [vmem:[#allocation5 + $0x34] sm:$0xf0]  ;;  %v1051_v26 = vld [vmem:[#allocation5 + $0x34] sm:$0xf]  ;;  %v945_v27 = vld [vmem:[#allocation5 + $0x38] sm:$0xf0] }
  0x16   :  { %215 = vmatpush.bf16.msra.mxu0 %v968_v10  ;;  %v944_v28 = vor.u32 %v1052_v25, %v943_v24  ;;  %v948_v29 = vor.u32 %v1051_v26, %v945_v27  ;;  %v935_v30 = vld [vmem:[#allocation5 + $0x20] sm:$0xf]  ;;  %v1050_v31 = vld [vmem:[#allocation5 + $0x24] sm:$0xf0]  ;;  %v1049_v32 = vld [vmem:[#allocation5 + $0x24] sm:$0xf] }
  0x17   :  { %264 = vmatpush.bf16.msra.mxu1 %v972_v11  ;;  %v937_v33 = vld [vmem:[#allocation5 + $0x28] sm:$0xf0]  ;;  %v936_v34 = vor.u32 %v1050_v31, %v935_v30  ;;  %v927_v36 = vld [vmem:[#allocation5 + $0x10] sm:$0xf]  ;;  %v1048_v37 = vld [vmem:[#allocation5 + $0x14] sm:$0xf0] }
  0x18   :  { %v940_v35 = vor.u32 %v1049_v32, %v937_v33  ;;  %v1047_v38 = vld [vmem:[#allocation5 + $0x14] sm:$0xf]  ;;  %v929_v39 = vld [vmem:[#allocation5 + $0x18] sm:$0xf0]  ;;  %v928_v40 = vor.u32 %v1048_v37, %v927_v36  ;;  %v919_v42 = vld [vmem:[#allocation5] sm:$0xf] }
  0x19   :  { %v932_v41 = vor.u32 %v1047_v38, %v929_v39  ;;  %v1046_v43 = vld [vmem:[#allocation5 + $0x4] sm:$0xf0]  ;;  %v1045_v44 = vld [vmem:[#allocation5 + $0x4] sm:$0xf]  ;;  %v921_v45 = vld [vmem:[#allocation5 + $0x8] sm:$0xf0] }
  0x1a   :  { %216 = vmatpush.bf16.msra.mxu0 %v960_v16  ;;  %v920_v46 = vor.u32 %v1046_v43, %v919_v42  ;;  %v1266_v47 = vld [vmem:[#allocation2] sm:$0xff]  ;;  %v1268_v48 = vld [vmem:[#allocation2 + $0x8] sm:$0xff]  ;;  %v924_v49 = vor.u32 %v1045_v44, %v921_v45  ;;  %v1272_v51 = vld [vmem:[#allocation2 + $0x10] sm:$0xff]  ;;  %s1230_s2 = smov [#allocation8]   ;;  %s903_s5 = sshll.u32 %s1517_s3, 4  ;;  %s904_s5 = int_to_ptr.hbm [resolvable:$true] %s903_s5 }
  0x1b   :  { %265 = vmatpush.bf16.msra.mxu1 %v964_v17  ;;  %v126_v50 = vpack.c.bf16 %v1268_v48, %v1266_v47  ;;  %v1274_v52 = vld [vmem:[#allocation2 + $0x18] sm:$0xff]  ;;  %v1278_v54 = vld [vmem:[#allocation2 + $0x20] sm:$0xff]  ;;  %v1280_v55 = vld [vmem:[#allocation2 + $0x28] sm:$0xff]  ;;  %s901_s29 = sshll.u32 %s1230_s2, 4  ;;  %s902_s29 = int_to_ptr.vmem [resolvable:$true] %s901_s29 }
  0x1c   :  { %v127_v53 = vpack.c.bf16 %v1274_v52, %v1272_v51  ;;  %v128_v56 = vpack.c.bf16 %v1280_v55, %v1278_v54  ;;  %v1284_v57 = vld [vmem:[#allocation2 + $0x30] sm:$0xff]  ;;  %v1286_v58 = vld [vmem:[#allocation2 + $0x38] sm:$0xff]  ;;  %v1290_v60 = vld [vmem:[#allocation2 + $0x40] sm:$0xff] }
  0x1d   :  { %v129_v59 = vpack.c.bf16 %v1286_v58, %v1284_v57  ;;  %v1292_v61 = vld [vmem:[#allocation2 + $0x48] sm:$0xff]  ;;  %v1068_v63 = vld [vmem:[#allocation7 + $0x38] sm:$0xff]  ;;  %v1067_v1 = vld [vmem:[#allocation7 + $0x30] sm:$0xff] }
  0x1e   :  { %217 = vmatpush.bf16.msra.mxu0 %v952_v22  ;;  %v130_v62 = vpack.c.bf16 %v1292_v61, %v1290_v60  ;;  %v1076_v0 = vld [vmem:[#allocation7 + $0x78] sm:$0xff]  ;;  %456 = vmatpush.bf16.msra.mxu2 %v1068_v63  ;;  %v1075_v2 = vld [vmem:[#allocation7 + $0x70] sm:$0xff]  ;;  %v1066_v6 = vld [vmem:[#allocation7 + $0x28] sm:$0xff] }
  0x1f   :  { %266 = vmatpush.bf16.msra.mxu1 %v956_v23  ;;  %505 = vmatpush.bf16.msra.mxu3 %v1076_v0  ;;  %v1296_v3 = vld [vmem:[#allocation2 + $0x50] sm:$0xff]  ;;  %v1298_v4 = vld [vmem:[#allocation2 + $0x58] sm:$0xff]  ;;  %v1074_v7 = vld [vmem:[#allocation7 + $0x68] sm:$0xff] }
  0x20   :  { %v131_v5 = vpack.c.bf16 %v1298_v4, %v1296_v3  ;;  %v1065_v8 = vld [vmem:[#allocation7 + $0x20] sm:$0xff]  ;;  %v1064_v10 = vld [vmem:[#allocation7 + $0x18] sm:$0xff]  ;;  %v1304_v13 = vld [vmem:[#allocation2 + $0x68] sm:$0xff] }
  0x21   :  { %v1073_v9 = vld [vmem:[#allocation7 + $0x60] sm:$0xff]  ;;  %v1072_v11 = vld [vmem:[#allocation7 + $0x58] sm:$0xff]  ;;  %v1063_v15 = vld [vmem:[#allocation7 + $0x10] sm:$0xff] }
  0x22   :  { %218 = vmatpush.bf16.msra.mxu0 %v944_v28  ;;  %457 = vmatpush.bf16.msra.mxu2 %v1067_v1  ;;  %v1302_v12 = vld [vmem:[#allocation2 + $0x60] sm:$0xff]  ;;  %v1071_v16 = vld [vmem:[#allocation7 + $0x50] sm:$0xff]  ;;  %v1062_v17 = vld [vmem:[#allocation7 + $0x8] sm:$0xff] }
  0x23   :  { %267 = vmatpush.bf16.msra.mxu1 %v948_v29  ;;  %506 = vmatpush.bf16.msra.mxu3 %v1075_v2  ;;  %v132_v14 = vpack.c.bf16 %v1304_v13, %v1302_v12  ;;  %v1070_v18 = vld [vmem:[#allocation7 + $0x48] sm:$0xff]  ;;  %v1061_v19 = vld [vmem:[#allocation7] sm:$0xff]  ;;  %v1308_v21 = vld [vmem:[#allocation2 + $0x70] sm:$0xff] }
  0x24   :  { %v1069_v20 = vld [vmem:[#allocation7 + $0x40] sm:$0xff]  ;;  %v1310_v22 = vld [vmem:[#allocation2 + $0x78] sm:$0xff] }
  0x25   :  { %v133_v23 = vpack.c.bf16 %v1310_v22, %v1308_v21 }
  0x26   :  { %219 = vmatpush.bf16.msra.mxu0 %v936_v34  ;;  %458 = vmatpush.bf16.msra.mxu2 %v1066_v6 }
  0x27   :  { %268 = vmatpush.bf16.msra.mxu1 %v940_v35  ;;  %507 = vmatpush.bf16.msra.mxu3 %v1074_v7 }
  0x2a   :  { %220 = vmatpush.bf16.msra.mxu0 %v928_v40  ;;  %459 = vmatpush.bf16.msra.mxu2 %v1065_v8 }
  0x2b   :  { %269 = vmatpush.bf16.msra.mxu1 %v932_v41  ;;  %508 = vmatpush.bf16.msra.mxu3 %v1073_v9 }
  0x2e   :  { %221 = vmatpush.bf16.msra.mxu0 %v920_v46  ;;  %460 = vmatpush.bf16.msra.mxu2 %v1064_v10 }
  0x2f   :  { %270 = vmatpush.bf16.msra.mxu1 %v924_v49  ;;  %509 = vmatpush.bf16.msra.mxu3 %v1072_v11 }
  0x31   :  { %222 = vmatmul.bf16.vlgmr.msra.gmra.mxu0 %v126_v50 }
  0x32   :  { %271 = vmatmul.bf16.vlgmr.msra.gmra.mxu1 %v126_v50  ;;  %461 = vmatpush.bf16.msra.mxu2 %v1063_v15 }
  0x33   :  { %510 = vmatpush.bf16.msra.mxu3 %v1071_v16 }
  0x36   :  { %462 = vmatpush.bf16.msra.mxu2 %v1062_v17 }
  0x37   :  { %511 = vmatpush.bf16.msra.mxu3 %v1070_v18 }
  0x3a   :  { %463 = vmatpush.bf16.msra.mxu2 %v1061_v19 }
  0x3b   :  { %512 = vmatpush.bf16.msra.mxu3 %v1069_v20 }
  0x41   :  { %227 = vmatmul.bf16.gmra.mxu0 %v127_v53 }
  0x42   :  { %276 = vmatmul.bf16.gmra.mxu1 %v127_v53 }
  0x51   :  { %232 = vmatmul.bf16.gmra.mxu0 %v128_v56 }
  0x52   :  { %281 = vmatmul.bf16.gmra.mxu1 %v128_v56 }
  0x61   :  { %237 = vmatmul.bf16.gmra.mxu0 %v129_v59 }
  0x62   :  { %286 = vmatmul.bf16.gmra.mxu1 %v129_v59 }
  0x71   :  { %242 = vmatmul.bf16.gmra.mxu0 %v130_v62 }
  0x72   :  { %291 = vmatmul.bf16.gmra.mxu1 %v130_v62 }
  0x81   :  { %247 = vmatmul.bf16.gmra.mxu0 %v131_v5 }
  0x82   :  { %296 = vmatmul.bf16.gmra.mxu1 %v131_v5 }
  0x91   :  { %252 = vmatmul.bf16.gmra.mxu0 %v132_v14 }
  0x92   :  { %301 = vmatmul.bf16.gmra.mxu1 %v132_v14 }
  0xa1   :  { %257 = vmatmul.bf16.gmra.mxu0 %v133_v23 }
  0xa2   :  { %306 = vmatmul.bf16.gmra.mxu1 %v133_v23 }
  0xae   :  { %v223_v24 = vpop.f32.mrf.mxu0 }
  0xaf   :  { %v272_v25 = vpop.f32.mrf.mxu1  ;;  %v312_v27 = vmax.f32 %v223_v24, 0.0 }
  0xb0   :  { %v313_v30 = vmax.f32 %v272_v25, 0.0 }
  0xb6   :  { %v225_v26 = vpop.f32.mrf.mxu0 }
  0xb7   :  { %v314_v28 = vmax.f32 %v225_v26, 0.0  ;;  %v274_v29 = vpop.f32.mrf.mxu1 }
  0xb8   :  { %v315_v31 = vmax.f32 %v274_v29, 0.0 }
  0xb9   :  { %v344_v32 = vpack.c.bf16 %v314_v28, %v312_v27 }
  0xba   :  { %v345_v33 = vpack.c.bf16 %v315_v31, %v313_v30 }
  0xbb   :  { %464 = vmatmul.bf16.vlgmr.msra.gmra.mxu2 %v344_v32 }
  0xbc   :  { %513 = vmatmul.bf16.vlgmr.msra.gmra.mxu3 %v345_v33 }
  0xbe   :  { %v228_v34 = vpop.f32.mrf.mxu0 }
  0xbf   :  { %v277_v35 = vpop.f32.mrf.mxu1  ;;  %v316_v37 = vmax.f32 %v228_v34, 0.0 }
  0xc0   :  { %v317_v40 = vmax.f32 %v277_v35, 0.0 }
  0xc6   :  { %v230_v36 = vpop.f32.mrf.mxu0 }
  0xc7   :  { %v318_v38 = vmax.f32 %v230_v36, 0.0  ;;  %v279_v39 = vpop.f32.mrf.mxu1 }
  0xc8   :  { %v319_v41 = vmax.f32 %v279_v39, 0.0 }
  0xc9   :  { %v346_v42 = vpack.c.bf16 %v318_v38, %v316_v37 }
  0xca   :  { %v347_v43 = vpack.c.bf16 %v319_v41, %v317_v40 }
  0xcb   :  { %469 = vmatmul.bf16.gmra.mxu2 %v346_v42 }
  0xcc   :  { %518 = vmatmul.bf16.gmra.mxu3 %v347_v43 }
  0xce   :  { %v233_v44 = vpop.f32.mrf.mxu0 }
  0xcf   :  { %v282_v45 = vpop.f32.mrf.mxu1  ;;  %v320_v49 = vmax.f32 %v233_v44, 0.0 }
  0xd0   :  { %v321_v56 = vmax.f32 %v282_v45, 0.0 }
  0xd6   :  { %v235_v46 = vpop.f32.mrf.mxu0 }
  0xd7   :  { %v322_v50 = vmax.f32 %v235_v46, 0.0  ;;  %v284_v53 = vpop.f32.mrf.mxu1 }
  0xd8   :  { %v323_v59 = vmax.f32 %v284_v53, 0.0 }
  0xd9   :  { %v348_v62 = vpack.c.bf16 %v322_v50, %v320_v49 }
  0xda   :  { %v349_v63 = vpack.c.bf16 %v323_v59, %v321_v56 }
  0xdb   :  { %474 = vmatmul.bf16.gmra.mxu2 %v348_v62 }
  0xdc   :  { %523 = vmatmul.bf16.gmra.mxu3 %v349_v63 }
  0xde   :  { %v238_v0 = vpop.f32.mrf.mxu0 }
  0xdf   :  { %v287_v1 = vpop.f32.mrf.mxu1  ;;  %v324_v5 = vmax.f32 %v238_v0, 0.0 }
  0xe0   :  { %v325_v8 = vmax.f32 %v287_v1, 0.0 }
  0xe6   :  { %v240_v2 = vpop.f32.mrf.mxu0 }
  0xe7   :  { %v326_v6 = vmax.f32 %v240_v2, 0.0  ;;  %v289_v7 = vpop.f32.mrf.mxu1 }
  0xe8   :  { %v327_v9 = vmax.f32 %v289_v7, 0.0 }
  0xe9   :  { %v350_v10 = vpack.c.bf16 %v326_v6, %v324_v5 }
  0xea   :  { %v351_v11 = vpack.c.bf16 %v327_v9, %v325_v8 }
  0xeb   :  { %479 = vmatmul.bf16.gmra.mxu2 %v350_v10 }
  0xec   :  { %528 = vmatmul.bf16.gmra.mxu3 %v351_v11 }
  0xee   :  { %v243_v14 = vpop.f32.mrf.mxu0 }
  0xef   :  { %v292_v15 = vpop.f32.mrf.mxu1  ;;  %v328_v17 = vmax.f32 %v243_v14, 0.0 }
  0xf0   :  { %v329_v20 = vmax.f32 %v292_v15, 0.0 }
  0xf6   :  { %v245_v16 = vpop.f32.mrf.mxu0 }
  0xf7   :  { %v330_v18 = vmax.f32 %v245_v16, 0.0  ;;  %v294_v19 = vpop.f32.mrf.mxu1 }
  0xf8   :  { %v331_v23 = vmax.f32 %v294_v19, 0.0 }
  0xf9   :  { %v352_v24 = vpack.c.bf16 %v330_v18, %v328_v17 }
  0xfa   :  { %v353_v25 = vpack.c.bf16 %v331_v23, %v329_v20 }
  0xfb   :  { %484 = vmatmul.bf16.gmra.mxu2 %v352_v24 }
  0xfc   :  { %533 = vmatmul.bf16.gmra.mxu3 %v353_v25 }
  0xfe   :  { %v248_v26 = vpop.f32.mrf.mxu0 }
  0xff   :  { %v297_v27 = vpop.f32.mrf.mxu1  ;;  %v332_v29 = vmax.f32 %v248_v26, 0.0 }
 0x100   :  { %v333_v32 = vmax.f32 %v297_v27, 0.0 }
 0x106   :  { %v250_v28 = vpop.f32.mrf.mxu0 }
 0x107   :  { %v334_v30 = vmax.f32 %v250_v28, 0.0  ;;  %v299_v31 = vpop.f32.mrf.mxu1 }
 0x108   :  { %v335_v33 = vmax.f32 %v299_v31, 0.0 }
 0x109   :  { %v354_v34 = vpack.c.bf16 %v334_v30, %v332_v29 }
 0x10a   :  { %v355_v35 = vpack.c.bf16 %v335_v33, %v333_v32 }
 0x10b   :  { %489 = vmatmul.bf16.gmra.mxu2 %v354_v34 }
 0x10c   :  { %538 = vmatmul.bf16.gmra.mxu3 %v355_v35 }
 0x10e   :  { %v253_v36 = vpop.f32.mrf.mxu0 }
 0x10f   :  { %v302_v37 = vpop.f32.mrf.mxu1  ;;  %v336_v39 = vmax.f32 %v253_v36, 0.0 }
 0x110   :  { %v337_v42 = vmax.f32 %v302_v37, 0.0 }
 0x116   :  { %v255_v38 = vpop.f32.mrf.mxu0 }
 0x117   :  { %v338_v40 = vmax.f32 %v255_v38, 0.0  ;;  %v304_v41 = vpop.f32.mrf.mxu1 }
 0x118   :  { %v339_v43 = vmax.f32 %v304_v41, 0.0 }
 0x119   :  { %v356_v44 = vpack.c.bf16 %v338_v40, %v336_v39 }
 0x11a   :  { %v357_v45 = vpack.c.bf16 %v339_v43, %v337_v42 }
 0x11b   :  { %494 = vmatmul.bf16.gmra.mxu2 %v356_v44 }
 0x11c   :  { %543 = vmatmul.bf16.gmra.mxu3 %v357_v45 }
 0x11e   :  { %v258_v46 = vpop.f32.mrf.mxu0 }
 0x11f   :  { %v307_v49 = vpop.f32.mrf.mxu1  ;;  %v340_v53 = vmax.f32 %v258_v46, 0.0 }
 0x120   :  { %v341_v62 = vmax.f32 %v307_v49, 0.0 }
 0x126   :  { %v260_v50 = vpop.f32.mrf.mxu0 }
 0x127   :  { %v342_v56 = vmax.f32 %v260_v50, 0.0  ;;  %v309_v59 = vpop.f32.mrf.mxu1 }
 0x128   :  { %v343_v63 = vmax.f32 %v309_v59, 0.0 }
 0x129   :  { %v358_v0 = vpack.c.bf16 %v342_v56, %v340_v53 }
 0x12a   :  { %v359_v1 = vpack.c.bf16 %v343_v63, %v341_v62 }
 0x12b   :  { %499 = vmatmul.bf16.gmra.mxu2 %v358_v0 }
 0x12c   :  { %548 = vmatmul.bf16.gmra.mxu3 %v359_v1 }
 0x13e   :  { %v465_v2 = vpop.f32.mrf.mxu2 }
 0x13f   :  { %v466_v5 = vadd.f32 %v465_v2, %v1266_v47  ;;  %v514_v6 = vpop.f32.mrf.mxu3 }
 0x141   :  { %v1315_v7 = vadd.f32 %v514_v6, %v466_v5 }
 0x143   :  { %554 = vadd.xlane.f32.xlu0 %v1315_v7 }
 0x146   :  { %v467_v8 = vpop.f32.mrf.mxu2 }
 0x147   :  { %v468_v9 = vadd.f32 %v467_v8, %v1268_v48  ;;  %v516_v10 = vpop.f32.mrf.mxu3 }
 0x149   :  { %v1319_v11 = vadd.f32 %v516_v10, %v468_v9 }
 0x14b   :  { %556 = vadd.xlane.f32.xlu0 %v1319_v11 }
 0x14e   :  { %v470_v14 = vpop.f32.mrf.mxu2 }
 0x14f   :  { %v471_v15 = vadd.f32 %v470_v14, %v1272_v51  ;;  %v519_v16 = vpop.f32.mrf.mxu3 }
 0x151   :  { %v1323_v17 = vadd.f32 %v519_v16, %v471_v15 }
 0x153   :  { %558 = vadd.xlane.f32.xlu1 %v1323_v17 }
 0x156   :  { %v472_v47 = vpop.f32.mrf.mxu2 }
 0x157   :  { %v473_v18 = vadd.f32 %v472_v47, %v1274_v52  ;;  %v521_v19 = vpop.f32.mrf.mxu3 }
 0x159   :  { %v1327_v20 = vadd.f32 %v521_v19, %v473_v18 }
 0x15b   :  { %560 = vadd.xlane.f32.xlu1 %v1327_v20 }
 0x15e   :  { %v475_v48 = vpop.f32.mrf.mxu2 }
 0x15f   :  { %v476_v23 = vadd.f32 %v475_v48, %v1278_v54  ;;  %v524_v24 = vpop.f32.mrf.mxu3 }
 0x161   :  { %v1331_v25 = vadd.f32 %v524_v24, %v476_v23 }
 0x163   :  { %562 = vadd.xlane.f32.xlu2 %v1331_v25 }
 0x166   :  { %v477_v51 = vpop.f32.mrf.mxu2 }
 0x167   :  { %v478_v26 = vadd.f32 %v477_v51, %v1280_v55  ;;  %v526_v27 = vpop.f32.mrf.mxu3 }
 0x169   :  { %v1335_v28 = vadd.f32 %v526_v27, %v478_v26 }
 0x16b   :  { %564 = vadd.xlane.f32.xlu2 %v1335_v28 }
 0x16e   :  { %v480_v52 = vpop.f32.mrf.mxu2 }
 0x16f   :  { %v481_v29 = vadd.f32 %v480_v52, %v1284_v57  ;;  %v529_v30 = vpop.f32.mrf.mxu3 }
 0x171   :  { %v1339_v31 = vadd.f32 %v529_v30, %v481_v29 }
 0x173   :  { %566 = vadd.xlane.f32.xlu0 %v1339_v31 }
 0x176   :  { %v482_v54 = vpop.f32.mrf.mxu2 }
 0x177   :  { %v483_v32 = vadd.f32 %v482_v54, %v1286_v58  ;;  %v531_v33 = vpop.f32.mrf.mxu3 }
 0x179   :  { %v1343_v34 = vadd.f32 %v531_v33, %v483_v32 }
 0x17b   :  { %568 = vadd.xlane.f32.xlu1 %v1343_v34 }
 0x17e   :  { %v485_v55 = vpop.f32.mrf.mxu2 }
 0x17f   :  { %v486_v35 = vadd.f32 %v485_v55, %v1290_v60  ;;  %v534_v36 = vpop.f32.mrf.mxu3 }
 0x181   :  { %v1347_v37 = vadd.f32 %v534_v36, %v486_v35 }
 0x183   :  { %570 = vadd.xlane.f32.xlu2 %v1347_v37 }
 0x186   :  { %v487_v57 = vpop.f32.mrf.mxu2 }
 0x187   :  { %v488_v38 = vadd.f32 %v487_v57, %v1292_v61  ;;  %v536_v39 = vpop.f32.mrf.mxu3  ;;  %v1229_v61 = vmov 128.0  }
 0x188   :  { %1086 = vrcp.f32 %v1229_v61 }
 0x189   :  { %v1351_v40 = vadd.f32 %v536_v39, %v488_v38 }
 0x18b   :  { %572 = vadd.xlane.f32.xlu0 %v1351_v40 }
 0x18e   :  { %v490_v58 = vpop.f32.mrf.mxu2 }
 0x18f   :  { %v491_v41 = vadd.f32 %v490_v58, %v1296_v3  ;;  %v539_v42 = vpop.f32.mrf.mxu3  ;;  %v1087_v3 = vpop.eup %1086 }
 0x190   :  { %v587_v59 = vmul.f32 128.0, %v1087_v3  ;;  %vm591_vm0 = vweird.f32 %v1087_v3 }
 0x191   :  { %v1355_v43 = vadd.f32 %v539_v42, %v491_v41 }
 0x192   :  { %v588_v0 = vsub.f32 1.0, %v587_v59 }
 0x193   :  { %574 = vadd.xlane.f32.xlu1 %v1355_v43 }
 0x194   :  { %v589_v2 = vmul.f32 %v1087_v3, %v588_v0 }
 0x196   :  { %v492_v60 = vpop.f32.mrf.mxu2  ;;  %v590_v8 = vadd.f32 %v1087_v3, %v589_v2 }
 0x197   :  { %v493_v44 = vadd.f32 %v492_v60, %v1298_v4  ;;  %v541_v45 = vpop.f32.mrf.mxu3 }
 0x198   :  { %v1374_v10 = vsel %vm591_vm0, %v1087_v3, %v590_v8 }
 0x199   :  { %v1359_v46 = vadd.f32 %v541_v45, %v493_v44 }
 0x19b   :  { %576 = vadd.xlane.f32.xlu2 %v1359_v46 }
 0x19e   :  { %v495_v49 = vpop.f32.mrf.mxu2 }
 0x19f   :  { %v496_v50 = vadd.f32 %v495_v49, %v1302_v12  ;;  %v544_v53 = vpop.f32.mrf.mxu3 }
 0x1a1   :  { %v1363_v56 = vadd.f32 %v544_v53, %v496_v50 }
 0x1a3   :  { %578 = vadd.xlane.f32.xlu0 %v1363_v56 }
 0x1a6   :  { %v497_v62 = vpop.f32.mrf.mxu2 }
 0x1a7   :  { %v498_v4 = vadd.f32 %v497_v62, %v1304_v13  ;;  %v546_v63 = vpop.f32.mrf.mxu3 }
 0x1a9   :  { %v1367_v1 = vadd.f32 %v546_v63, %v498_v4 }
 0x1ab   :  { %580 = vadd.xlane.f32.xlu1 %v1367_v1 }
 0x1ae   :  { %v500_v5 = vpop.f32.mrf.mxu2 }
 0x1af   :  { %v501_v12 = vadd.f32 %v500_v5, %v1308_v21  ;;  %v549_v6 = vpop.f32.mrf.mxu3 }
 0x1b1   :  { %v1371_v9 = vadd.f32 %v549_v6, %v501_v12 }
 0x1b3   :  { %582 = vadd.xlane.f32.xlu2 %v1371_v9 }
 0x1b6   :  { %v555_v13 = vpop.xlane.xlu0 %554  ;;  %v502_v14 = vpop.f32.mrf.mxu2 }
 0x1b7   :  { %v593_v15 = vmul.f32 %v1374_v10, %v555_v13  ;;  %v503_v16 = vadd.f32 %v502_v14, %v1310_v22  ;;  %v551_v47 = vpop.f32.mrf.mxu3 }
 0x1b9   :  { %v1379_v18 = vsub.f32 %v1315_v7, %v593_v15  ;;  %v1381_v21 = vadd.f32 %v551_v47, %v503_v16 }
 0x1bb   :  { %584 = vadd.xlane.f32.xlu0 %v1381_v21  ;;  %v625_v19 = vmul.f32 %v1379_v18, %v1379_v18 }
 0x1bd   :  { %641 = vadd.xlane.f32.xlu1 %v625_v19 }
 0x1be   :  { %v557_v48 = vpop.xlane.xlu0 %556 }
 0x1bf   :  { %v594_v23 = vmul.f32 %v1374_v10, %v557_v48 }
 0x1c1   :  { %v1388_v24 = vsub.f32 %v1319_v11, %v594_v23 }
 0x1c3   :  { %v626_v22 = vmul.f32 %v1388_v24, %v1388_v24 }
 0x1c5   :  { %643 = vadd.xlane.f32.xlu2 %v626_v22 }
 0x1c6   :  { %v559_v7 = vpop.xlane.xlu1 %558 }
 0x1c7   :  { %v595_v51 = vmul.f32 %v1374_v10, %v559_v7 }
 0x1c9   :  { %v1394_v26 = vsub.f32 %v1323_v17, %v595_v51 }
 0x1cb   :  { %v627_v27 = vmul.f32 %v1394_v26, %v1394_v26 }
 0x1cd   :  { %645 = vadd.xlane.f32.xlu0 %v627_v27 }
 0x1ce   :  { %v561_v52 = vpop.xlane.xlu1 %560 }
 0x1cf   :  { %v596_v29 = vmul.f32 %v1374_v10, %v561_v52 }
 0x1d1   :  { %v1400_v11 = vsub.f32 %v1327_v20, %v596_v29 }
 0x1d3   :  { %v628_v30 = vmul.f32 %v1400_v11, %v1400_v11 }
 0x1d5   :  { %647 = vadd.xlane.f32.xlu1 %v628_v30 }
 0x1d6   :  { %v563_v54 = vpop.xlane.xlu2 %562 }
 0x1d7   :  { %v597_v32 = vmul.f32 %v1374_v10, %v563_v54 }
 0x1d9   :  { %v1406_v17 = vsub.f32 %v1331_v25, %v597_v32 }
 0x1db   :  { %v629_v33 = vmul.f32 %v1406_v17, %v1406_v17 }
 0x1dd   :  { %649 = vadd.xlane.f32.xlu2 %v629_v33 }
 0x1de   :  { %v565_v55 = vpop.xlane.xlu2 %564 }
 0x1df   :  { %v598_v35 = vmul.f32 %v1374_v10, %v565_v55 }
 0x1e1   :  { %v1412_v20 = vsub.f32 %v1335_v28, %v598_v35 }
 0x1e3   :  { %v630_v36 = vmul.f32 %v1412_v20, %v1412_v20 }
 0x1e5   :  { %651 = vadd.xlane.f32.xlu0 %v630_v36 }
 0x1e6   :  { %v567_v57 = vpop.xlane.xlu0 %566 }
 0x1e7   :  { %v599_v38 = vmul.f32 %v1374_v10, %v567_v57 }
 0x1e9   :  { %v1418_v25 = vsub.f32 %v1339_v31, %v599_v38 }
 0x1eb   :  { %v631_v39 = vmul.f32 %v1418_v25, %v1418_v25 }
 0x1ed   :  { %653 = vadd.xlane.f32.xlu1 %v631_v39 }
 0x1ee   :  { %v569_v58 = vpop.xlane.xlu1 %568 }
 0x1ef   :  { %v600_v41 = vmul.f32 %v1374_v10, %v569_v58 }
 0x1f1   :  { %v1424_v28 = vsub.f32 %v1343_v34, %v600_v41 }
 0x1f3   :  { %v632_v42 = vmul.f32 %v1424_v28, %v1424_v28 }
 0x1f5   :  { %655 = vadd.xlane.f32.xlu2 %v632_v42 }
 0x1f6   :  { %v571_v60 = vpop.xlane.xlu2 %570 }
 0x1f7   :  { %v601_v44 = vmul.f32 %v1374_v10, %v571_v60 }
 0x1f9   :  { %v1430_v31 = vsub.f32 %v1347_v37, %v601_v44 }
 0x1fb   :  { %v633_v45 = vmul.f32 %v1430_v31, %v1430_v31 }
 0x1fd   :  { %657 = vadd.xlane.f32.xlu0 %v633_v45 }
 0x1fe   :  { %v573_v61 = vpop.xlane.xlu0 %572 }
 0x1ff   :  { %v602_v49 = vmul.f32 %v1374_v10, %v573_v61 }
 0x201   :  { %v1436_v34 = vsub.f32 %v1351_v40, %v602_v49 }
 0x203   :  { %v634_v50 = vmul.f32 %v1436_v34, %v1436_v34 }
 0x205   :  { %659 = vadd.xlane.f32.xlu1 %v634_v50 }
 0x206   :  { %v575_v53 = vpop.xlane.xlu1 %574 }
 0x207   :  { %v603_v3 = vmul.f32 %v1374_v10, %v575_v53 }
 0x209   :  { %v1442_v37 = vsub.f32 %v1355_v43, %v603_v3 }
 0x20b   :  { %v635_v59 = vmul.f32 %v1442_v37, %v1442_v37 }
 0x20d   :  { %661 = vadd.xlane.f32.xlu2 %v635_v59 }
 0x20e   :  { %v577_v62 = vpop.xlane.xlu2 %576 }
 0x20f   :  { %v604_v4 = vmul.f32 %v1374_v10, %v577_v62 }
 0x211   :  { %v1448_v40 = vsub.f32 %v1359_v46, %v604_v4 }
 0x213   :  { %v636_v63 = vmul.f32 %v1448_v40, %v1448_v40 }
 0x215   :  { %663 = vadd.xlane.f32.xlu0 %v636_v63 }
 0x216   :  { %v579_v0 = vpop.xlane.xlu0 %578 }
 0x217   :  { %v605_v2 = vmul.f32 %v1374_v10, %v579_v0 }
 0x219   :  { %v1454_v43 = vsub.f32 %v1363_v56, %v605_v2 }
 0x21b   :  { %v637_v5 = vmul.f32 %v1454_v43, %v1454_v43 }
 0x21d   :  { %665 = vadd.xlane.f32.xlu1 %v637_v5 }
 0x21e   :  { %v581_v12 = vpop.xlane.xlu1 %580 }
 0x21f   :  { %v606_v6 = vmul.f32 %v1374_v10, %v581_v12 }
 0x221   :  { %v1460_v46 = vsub.f32 %v1367_v1, %v606_v6 }
 0x223   :  { %v638_v8 = vmul.f32 %v1460_v46, %v1460_v46 }
 0x225   :  { %667 = vadd.xlane.f32.xlu2 %v638_v8 }
 0x226   :  { %v583_v13 = vpop.xlane.xlu2 %582 }
 0x227   :  { %v607_v14 = vmul.f32 %v1374_v10, %v583_v13 }
 0x229   :  { %v1466_v56 = vsub.f32 %v1371_v9, %v607_v14 }
 0x22b   :  { %v639_v15 = vmul.f32 %v1466_v56, %v1466_v56 }
 0x22d   :  { %669 = vadd.xlane.f32.xlu0 %v639_v15 }
 0x22e   :  { %v585_v16 = vpop.xlane.xlu0 %584 }
 0x22f   :  { %v608_v47 = vmul.f32 %v1374_v10, %v585_v16 }
 0x230   :  { %v642_v19 = vpop.xlane.xlu1 %641 }
 0x231   :  { %v1472_v1 = vsub.f32 %v1381_v21, %v608_v47  ;;  %v673_v48 = vmul.f32 %v642_v19, %v1374_v10 }
 0x233   :  { %v689_v23 = vadd.f32 1e-05, %v673_v48  ;;  %v640_v22 = vmul.f32 %v1472_v1, %v1472_v1 }
 0x235   :  { %1088 = vrsqrt.f32 %v689_v23  ;;  %671 = vadd.xlane.f32.xlu1 %v640_v22  ;;  %vm711_vm2 = vweird.f32 %v689_v23 }
 0x238   :  { %v644_v9 = vpop.xlane.xlu2 %643 }
 0x239   :  { %v674_v7 = vmul.f32 %v644_v9, %v1374_v10 }
 0x23b   :  { %v1089_v51 = vpop.eup %1088  ;;  %v690_v27 = vadd.f32 1e-05, %v674_v7 }
 0x23c   :  { %v706_v52 = vmul.f32 %v1089_v51, %v689_v23  ;;  %vm712_vm1 = vweird.f32 %v1089_v51 }
 0x23d   :  { %1090 = vrsqrt.f32 %v690_v27  ;;  %vm713_vm3 = vmor %vm711_vm2, %vm712_vm1  ;;  %vm721_vm5 = vweird.f32 %v690_v27 }
 0x23e   :  { %v707_v29 = vmul.f32 %v1089_v51, %v706_v52 }
 0x240   :  { %v708_v30 = vmul.f32 0.5, %v707_v29  ;;  %v646_v54 = vpop.xlane.xlu0 %645 }
 0x241   :  { %v675_v21 = vmul.f32 %v646_v54, %v1374_v10 }
 0x242   :  { %v709_v32 = vsub.f32 1.5, %v708_v30 }
 0x243   :  { %v1091_v33 = vpop.eup %1090  ;;  %v691_v55 = vadd.f32 1e-05, %v675_v21 }
 0x244   :  { %v710_v35 = vmul.f32 %v1089_v51, %v709_v32  ;;  %v716_v36 = vmul.f32 %v1091_v33, %v690_v27  ;;  %vm722_vm4 = vweird.f32 %v1091_v33 }
 0x245   :  { %1092 = vrsqrt.f32 %v691_v55  ;;  %vm723_vm6 = vmor %vm721_vm5, %vm722_vm4  ;;  %vm731_vm8 = vweird.f32 %v691_v55 }
 0x246   :  { %v714_v57 = vsel %vm713_vm3, %v1089_v51, %v710_v35  ;;  %v717_v38 = vmul.f32 %v1091_v33, %v716_v36 }
 0x247   :  { %v865_v39 = vmul.f32 %v714_v57, %v1379_v18 }
 0x248   :  { %v718_v58 = vmul.f32 0.5, %v717_v38  ;;  %v648_v41 = vpop.xlane.xlu1 %647 }
 0x249   :  { %881 = vst [vmem:[#allocation8] sm:$0xff] %v865_v39  ;;  %v676_v42 = vmul.f32 %v648_v41, %v1374_v10 }
 0x24a   :  { %v719_v60 = vsub.f32 1.5, %v718_v58 }
 0x24b   :  { %v1093_v44 = vpop.eup %1092  ;;  %v692_v45 = vadd.f32 1e-05, %v676_v42 }
 0x24c   :  { %v720_v61 = vmul.f32 %v1091_v33, %v719_v60  ;;  %v726_v49 = vmul.f32 %v1093_v44, %v691_v55  ;;  %vm732_vm7 = vweird.f32 %v1093_v44 }
 0x24d   :  { %1094 = vrsqrt.f32 %v692_v45  ;;  %vm733_vm9 = vmor %vm731_vm8, %vm732_vm7  ;;  %vm741_vm11 = vweird.f32 %v692_v45 }
 0x24e   :  { %v724_v50 = vsel %vm723_vm6, %v1091_v33, %v720_v61  ;;  %v727_v53 = vmul.f32 %v1093_v44, %v726_v49 }
 0x24f   :  { %v866_v3 = vmul.f32 %v724_v50, %v1388_v24 }
 0x250   :  { %v728_v59 = vmul.f32 0.5, %v727_v53  ;;  %v650_v18 = vpop.xlane.xlu2 %649 }
 0x251   :  { %882 = vst [vmem:[#allocation8 + $0x8] sm:$0xff] %v866_v3  ;;  %v677_v62 = vmul.f32 %v650_v18, %v1374_v10 }
 0x252   :  { %v729_v4 = vsub.f32 1.5, %v728_v59 }
 0x253   :  { %v1095_v63 = vpop.eup %1094  ;;  %v693_v0 = vadd.f32 1e-05, %v677_v62 }
 0x254   :  { %v730_v2 = vmul.f32 %v1093_v44, %v729_v4  ;;  %v736_v5 = vmul.f32 %v1095_v63, %v692_v45  ;;  %vm742_vm10 = vweird.f32 %v1095_v63 }
 0x255   :  { %1096 = vrsqrt.f32 %v693_v0  ;;  %vm743_vm12 = vmor %vm741_vm11, %vm742_vm10  ;;  %vm751_vm14 = vweird.f32 %v693_v0 }
 0x256   :  { %v734_v12 = vsel %vm733_vm9, %v1093_v44, %v730_v2  ;;  %v737_v6 = vmul.f32 %v1095_v63, %v736_v5 }
 0x257   :  { %v867_v8 = vmul.f32 %v734_v12, %v1394_v26 }
 0x258   :  { %v738_v13 = vmul.f32 0.5, %v737_v6  ;;  %v652_v24 = vpop.xlane.xlu0 %651 }
 0x259   :  { %883 = vst [vmem:[#allocation8 + $0x10] sm:$0xff] %v867_v8  ;;  %v678_v14 = vmul.f32 %v652_v24, %v1374_v10 }
 0x25a   :  { %v739_v15 = vsub.f32 1.5, %v738_v13 }
 0x25b   :  { %v1097_v16 = vpop.eup %1096  ;;  %v694_v47 = vadd.f32 1e-05, %v678_v14 }
 0x25c   :  { %v740_v19 = vmul.f32 %v1095_v63, %v739_v15  ;;  %v746_v48 = vmul.f32 %v1097_v16, %v693_v0  ;;  %vm752_vm13 = vweird.f32 %v1097_v16 }
 0x25d   :  { %1098 = vrsqrt.f32 %v694_v47  ;;  %vm753_vm15 = vmor %vm751_vm14, %vm752_vm13  ;;  %vm761_vm1 = vweird.f32 %v694_v47 }
 0x25e   :  { %v744_v23 = vsel %vm743_vm12, %v1095_v63, %v740_v19  ;;  %v747_v22 = vmul.f32 %v1097_v16, %v746_v48 }
 0x25f   :  { %v868_v9 = vmul.f32 %v744_v23, %v1400_v11 }
 0x260   :  { %v748_v7 = vmul.f32 0.5, %v747_v22  ;;  %v654_v26 = vpop.xlane.xlu1 %653 }
 0x261   :  { %884 = vst [vmem:[#allocation8 + $0x18] sm:$0xff] %v868_v9  ;;  %v679_v51 = vmul.f32 %v654_v26, %v1374_v10 }
 0x262   :  { %v749_v27 = vsub.f32 1.5, %v748_v7 }
 0x263   :  { %v1099_v52 = vpop.eup %1098  ;;  %v695_v29 = vadd.f32 1e-05, %v679_v51 }
 0x264   :  { %v750_v30 = vmul.f32 %v1097_v16, %v749_v27  ;;  %v756_v54 = vmul.f32 %v1099_v52, %v694_v47  ;;  %vm762_vm0 = vweird.f32 %v1099_v52 }
 0x265   :  { %1100 = vrsqrt.f32 %v695_v29  ;;  %vm763_vm2 = vmor %vm761_vm1, %vm762_vm0  ;;  %vm771_vm4 = vweird.f32 %v695_v29 }
 0x266   :  { %v754_v21 = vsel %vm753_vm15, %v1097_v16, %v750_v30  ;;  %v757_v32 = vmul.f32 %v1099_v52, %v756_v54 }
 0x267   :  { %v869_v33 = vmul.f32 %v754_v21, %v1406_v17 }
 0x268   :  { %v758_v55 = vmul.f32 0.5, %v757_v32  ;;  %v656_v11 = vpop.xlane.xlu2 %655 }
 0x269   :  { %885 = vst [vmem:[#allocation8 + $0x20] sm:$0xff] %v869_v33  ;;  %v680_v35 = vmul.f32 %v656_v11, %v1374_v10 }
 0x26a   :  { %v759_v36 = vsub.f32 1.5, %v758_v55 }
 0x26b   :  { %v1101_v57 = vpop.eup %1100  ;;  %v696_v38 = vadd.f32 1e-05, %v680_v35 }
 0x26c   :  { %v760_v39 = vmul.f32 %v1099_v52, %v759_v36  ;;  %v766_v58 = vmul.f32 %v1101_v57, %v695_v29  ;;  %vm772_vm3 = vweird.f32 %v1101_v57 }
 0x26d   :  { %1102 = vrsqrt.f32 %v696_v38  ;;  %vm773_vm5 = vmor %vm771_vm4, %vm772_vm3  ;;  %vm781_vm7 = vweird.f32 %v696_v38 }
 0x26e   :  { %v764_v41 = vsel %vm763_vm2, %v1099_v52, %v760_v39  ;;  %v767_v42 = vmul.f32 %v1101_v57, %v766_v58 }
 0x26f   :  { %v870_v60 = vmul.f32 %v764_v41, %v1412_v20 }
 0x270   :  { %v768_v44 = vmul.f32 0.5, %v767_v42  ;;  %v658_v17 = vpop.xlane.xlu0 %657 }
 0x271   :  { %886 = vst [vmem:[#allocation8 + $0x28] sm:$0xff] %v870_v60  ;;  %v681_v45 = vmul.f32 %v658_v17, %v1374_v10 }
 0x272   :  { %v769_v61 = vsub.f32 1.5, %v768_v44 }
 0x273   :  { %v1103_v49 = vpop.eup %1102  ;;  %v697_v50 = vadd.f32 1e-05, %v681_v45 }
 0x274   :  { %v770_v53 = vmul.f32 %v1101_v57, %v769_v61  ;;  %v776_v3 = vmul.f32 %v1103_v49, %v696_v38  ;;  %vm782_vm6 = vweird.f32 %v1103_v49 }
 0x275   :  { %1104 = vrsqrt.f32 %v697_v50  ;;  %vm783_vm8 = vmor %vm781_vm7, %vm782_vm6  ;;  %vm791_vm10 = vweird.f32 %v697_v50 }
 0x276   :  { %v774_v59 = vsel %vm773_vm5, %v1101_v57, %v770_v53  ;;  %v777_v18 = vmul.f32 %v1103_v49, %v776_v3 }
 0x277   :  { %v871_v62 = vmul.f32 %v774_v59, %v1418_v25 }
 0x278   :  { %v778_v4 = vmul.f32 0.5, %v777_v18  ;;  %v660_v20 = vpop.xlane.xlu1 %659 }
 0x279   :  { %887 = vst [vmem:[#allocation8 + $0x30] sm:$0xff] %v871_v62  ;;  %v682_v63 = vmul.f32 %v660_v20, %v1374_v10 }
 0x27a   :  { %v779_v0 = vsub.f32 1.5, %v778_v4 }
 0x27b   :  { %v1105_v2 = vpop.eup %1104  ;;  %v698_v5 = vadd.f32 1e-05, %v682_v63 }
 0x27c   :  { %v780_v12 = vmul.f32 %v1103_v49, %v779_v0  ;;  %v786_v6 = vmul.f32 %v1105_v2, %v697_v50  ;;  %vm792_vm9 = vweird.f32 %v1105_v2 }
 0x27d   :  { %1106 = vrsqrt.f32 %v698_v5  ;;  %vm793_vm11 = vmor %vm791_vm10, %vm792_vm9  ;;  %vm801_vm13 = vweird.f32 %v698_v5 }
 0x27e   :  { %v784_v8 = vsel %vm783_vm8, %v1103_v49, %v780_v12  ;;  %v787_v13 = vmul.f32 %v1105_v2, %v786_v6 }
 0x27f   :  { %v872_v24 = vmul.f32 %v784_v8, %v1424_v28 }
 0x280   :  { %v788_v14 = vmul.f32 0.5, %v787_v13  ;;  %v662_v25 = vpop.xlane.xlu2 %661 }
 0x281   :  { %888 = vst [vmem:[#allocation8 + $0x38] sm:$0xff] %v872_v24  ;;  %v683_v15 = vmul.f32 %v662_v25, %v1374_v10 }
 0x282   :  { %v789_v16 = vsub.f32 1.5, %v788_v14 }
 0x283   :  { %v1107_v47 = vpop.eup %1106  ;;  %v699_v19 = vadd.f32 1e-05, %v683_v15 }
 0x284   :  { %v790_v48 = vmul.f32 %v1105_v2, %v789_v16  ;;  %v796_v23 = vmul.f32 %v1107_v47, %v698_v5  ;;  %vm802_vm12 = vweird.f32 %v1107_v47 }
 0x285   :  { %1108 = vrsqrt.f32 %v699_v19  ;;  %vm803_vm14 = vmor %vm801_vm13, %vm802_vm12  ;;  %vm811_vm0 = vweird.f32 %v699_v19 }
 0x286   :  { %v794_v22 = vsel %vm793_vm11, %v1105_v2, %v790_v48  ;;  %v797_v9 = vmul.f32 %v1107_v47, %v796_v23 }
 0x287   :  { %v873_v7 = vmul.f32 %v794_v22, %v1430_v31 }
 0x288   :  { %v798_v26 = vmul.f32 0.5, %v797_v9  ;;  %v664_v28 = vpop.xlane.xlu0 %663 }
 0x289   :  { %889 = vst [vmem:[#allocation8 + $0x40] sm:$0xff] %v873_v7  ;;  %v684_v51 = vmul.f32 %v664_v28, %v1374_v10 }
 0x28a   :  { %v799_v27 = vsub.f32 1.5, %v798_v26 }
 0x28b   :  { %v1109_v52 = vpop.eup %1108  ;;  %v700_v29 = vadd.f32 1e-05, %v684_v51 }
 0x28c   :  { %v800_v30 = vmul.f32 %v1107_v47, %v799_v27  ;;  %v806_v54 = vmul.f32 %v1109_v52, %v699_v19  ;;  %vm812_vm15 = vweird.f32 %v1109_v52 }
 0x28d   :  { %1110 = vrsqrt.f32 %v700_v29  ;;  %vm813_vm1 = vmor %vm811_vm0, %vm812_vm15  ;;  %vm821_vm3 = vweird.f32 %v700_v29 }
 0x28e   :  { %v804_v21 = vsel %vm803_vm14, %v1107_v47, %v800_v30  ;;  %v807_v32 = vmul.f32 %v1109_v52, %v806_v54 }
 0x28f   :  { %v874_v33 = vmul.f32 %v804_v21, %v1436_v34 }
 0x290   :  { %v808_v55 = vmul.f32 0.5, %v807_v32  ;;  %v666_v31 = vpop.xlane.xlu1 %665 }
 0x291   :  { %890 = vst [vmem:[#allocation8 + $0x48] sm:$0xff] %v874_v33  ;;  %v685_v11 = vmul.f32 %v666_v31, %v1374_v10 }
 0x292   :  { %v809_v35 = vsub.f32 1.5, %v808_v55 }
 0x293   :  { %v1111_v36 = vpop.eup %1110  ;;  %v701_v57 = vadd.f32 1e-05, %v685_v11 }
 0x294   :  { %v810_v38 = vmul.f32 %v1109_v52, %v809_v35  ;;  %v816_v39 = vmul.f32 %v1111_v36, %v700_v29  ;;  %vm822_vm2 = vweird.f32 %v1111_v36 }
 0x295   :  { %1112 = vrsqrt.f32 %v701_v57  ;;  %vm823_vm4 = vmor %vm821_vm3, %vm822_vm2  ;;  %vm831_vm6 = vweird.f32 %v701_v57 }
 0x296   :  { %v814_v58 = vsel %vm813_vm1, %v1109_v52, %v810_v38  ;;  %v817_v41 = vmul.f32 %v1111_v36, %v816_v39 }
 0x297   :  { %v875_v42 = vmul.f32 %v814_v58, %v1442_v37 }
 0x298   :  { %v818_v60 = vmul.f32 0.5, %v817_v41  ;;  %v668_v34 = vpop.xlane.xlu2 %667 }
 0x299   :  { %891 = vst [vmem:[#allocation8 + $0x50] sm:$0xff] %v875_v42  ;;  %v686_v44 = vmul.f32 %v668_v34, %v1374_v10 }
 0x29a   :  { %v819_v17 = vsub.f32 1.5, %v818_v60 }
 0x29b   :  { %v1113_v45 = vpop.eup %1112  ;;  %v702_v61 = vadd.f32 1e-05, %v686_v44 }
 0x29c   :  { %v820_v49 = vmul.f32 %v1111_v36, %v819_v17  ;;  %v826_v50 = vmul.f32 %v1113_v45, %v701_v57  ;;  %vm832_vm5 = vweird.f32 %v1113_v45 }
 0x29d   :  { %1114 = vrsqrt.f32 %v702_v61  ;;  %vm833_vm7 = vmor %vm831_vm6, %vm832_vm5  ;;  %vm841_vm9 = vweird.f32 %v702_v61 }
 0x29e   :  { %v824_v53 = vsel %vm823_vm4, %v1111_v36, %v820_v49  ;;  %v827_v3 = vmul.f32 %v1113_v45, %v826_v50 }
 0x29f   :  { %v876_v59 = vmul.f32 %v824_v53, %v1448_v40 }
 0x2a0   :  { %v828_v18 = vmul.f32 0.5, %v827_v3  ;;  %v670_v37 = vpop.xlane.xlu0 %669 }
 0x2a1   :  { %892 = vst [vmem:[#allocation8 + $0x58] sm:$0xff] %v876_v59  ;;  %v687_v62 = vmul.f32 %v670_v37, %v1374_v10 }
 0x2a2   :  { %v829_v4 = vsub.f32 1.5, %v828_v18 }
 0x2a3   :  { %v1115_v20 = vpop.eup %1114  ;;  %v703_v63 = vadd.f32 1e-05, %v687_v62 }
 0x2a4   :  { %v830_v0 = vmul.f32 %v1113_v45, %v829_v4  ;;  %v836_v2 = vmul.f32 %v1115_v20, %v702_v61  ;;  %vm842_vm8 = vweird.f32 %v1115_v20 }
 0x2a5   :  { %1116 = vrsqrt.f32 %v703_v63  ;;  %vm843_vm10 = vmor %vm841_vm9, %vm842_vm8  ;;  %vm851_vm12 = vweird.f32 %v703_v63 }
 0x2a6   :  { %v834_v5 = vsel %vm833_vm7, %v1113_v45, %v830_v0  ;;  %v837_v12 = vmul.f32 %v1115_v20, %v836_v2 }
 0x2a7   :  { %v877_v6 = vmul.f32 %v834_v5, %v1454_v43 }
 0x2a8   :  { %v838_v8 = vmul.f32 0.5, %v837_v12  ;;  %v672_v40 = vpop.xlane.xlu1 %671 }
 0x2a9   :  { %893 = vst [vmem:[#allocation8 + $0x60] sm:$0xff] %v877_v6  ;;  %v688_v13 = vmul.f32 %v672_v40, %v1374_v10 }
 0x2aa   :  { %v839_v24 = vsub.f32 1.5, %v838_v8 }
 0x2ab   :  { %v1117_v14 = vpop.eup %1116  ;;  %v704_v25 = vadd.f32 1e-05, %v688_v13 }
 0x2ac   :  { %v840_v15 = vmul.f32 %v1115_v20, %v839_v24  ;;  %v846_v16 = vmul.f32 %v1117_v14, %v703_v63  ;;  %vm852_vm11 = vweird.f32 %v1117_v14 }
 0x2ad   :  { %1118 = vrsqrt.f32 %v704_v25  ;;  %vm853_vm13 = vmor %vm851_vm12, %vm852_vm11  ;;  %vm861_vm15 = vweird.f32 %v704_v25 }
 0x2ae   :  { %v844_v47 = vsel %vm843_vm10, %v1115_v20, %v840_v15  ;;  %v847_v19 = vmul.f32 %v1117_v14, %v846_v16 }
 0x2af   :  { %v878_v48 = vmul.f32 %v844_v47, %v1460_v46 }
 0x2b0   :  { %v848_v23 = vmul.f32 0.5, %v847_v19 }
 0x2b1   :  { %894 = vst [vmem:[#allocation8 + $0x68] sm:$0xff] %v878_v48 }
 0x2b2   :  { %v849_v43 = vsub.f32 1.5, %v848_v23 }
 0x2b3   :  { %v1119_v22 = vpop.eup %1118 }
 0x2b4   :  { %v850_v9 = vmul.f32 %v1117_v14, %v849_v43  ;;  %v856_v10 = vmul.f32 %v1119_v22, %v704_v25  ;;  %vm862_vm14 = vweird.f32 %v1119_v22 }
 0x2b5   :  { %vm863_vm0 = vmor %vm861_vm15, %vm862_vm14 }
 0x2b6   :  { %v854_v7 = vsel %vm853_vm13, %v1117_v14, %v850_v9  ;;  %v857_v26 = vmul.f32 %v1119_v22, %v856_v10 }
 0x2b7   :  { %v879_v28 = vmul.f32 %v854_v7, %v1466_v56 }
 0x2b8   :  { %v858_v51 = vmul.f32 0.5, %v857_v26 }
 0x2b9   :  { %895 = vst [vmem:[#allocation8 + $0x70] sm:$0xff] %v879_v28 }
 0x2ba   :  { %v859_v27 = vsub.f32 1.5, %v858_v51 }
 0x2bc   :  { %v860_v52 = vmul.f32 %v1119_v22, %v859_v27 }
 0x2be   :  { %v864_v46 = vsel %vm863_vm0, %v1119_v22, %v860_v52 }
 0x2bf   :  { %v880_v29 = vmul.f32 %v864_v46, %v1472_v1 }
 0x2c1   :  { %896 = vst [vmem:[#allocation8 + $0x78] sm:$0xff] %v880_v29 }
 0x2c2   :  { %909 = dma.vmem_to_hbm [thread:$0]  %s902_s29, 2048, %s904_s5, [#allocation4], %s1223_s20, %s1223_s20, %s1224_s21  }
 0x2c3   :  { %1220 = dma.done.wait [#allocation4], 2048  }
 0x2c4   :  { %1221 = vsyncadd [#allocation4], 4294965248 }
 0x2c5   :  { %914 = vsyncpa [#allocation3], 1 }
 0x2c6   :  { %915 = vsyncpa [#allocation6], 1 }
 0x2c7   :  { %916 = vsyncpa [#allocation4], 1 }

// kernel: tpu_custom_call.1
= control target key start
LH: loop header
LB: loop body
LE: loop exit
PB: predicated region body
PF: predicated region fallthrough
CT: control target
= control target key end

     0   :  { %8 = vsyncpa [#allocation3], 0  ;;  %s1514_s0 = inlined_call_operand.hbm [shape: f32[128,128], index: 0, kind: input, shape index: {}]   ;;  %s1515_s1 = inlined_call_operand.hbm [shape: bf16[128,256], index: 1, kind: input, shape index: {}]   ;;  %s1516_s2 = inlined_call_operand.hbm [shape: bf16[256,128], index: 2, kind: input, shape index: {}]   ;;  %s1517_s3 = inlined_call_operand.hbm [shape: f32[128,128], index: 3, kind: output, shape index: {}]  }
   0x1   :  { %9 = vsyncpa [#allocation6], 0 }
   0x2   :  { %10 = vsyncpa [#allocation4], 0  ;;  %s28_s14 = sshll.u32 %s1515_s1, 4  ;;  %s1222_s15 = smov [#allocation5]   ;;  %s29_s14 = int_to_ptr.hbm [resolvable:$true] %s28_s14 }
   0x3   :  { %s30_s16 = sshll.u32 %s1222_s15, 4  ;;  %s15_s19 = sshll.u32 %s1514_s0, 4  ;;  %s31_s16 = int_to_ptr.vmem [resolvable:$true] %s30_s16  ;;  %s16_s19 = int_to_ptr.hbm [resolvable:$true] %s15_s19 }
   0x4   :  { %s1223_s20 = smov 128   ;;  %s1224_s21 = smov 8  }
   0x5   :  { %36 = dma.hbm_to_vmem [thread:$0]  %s29_s14, 2048, %s31_s16, [#allocation6], %s1223_s20, %s1223_s20, %s1224_s21  }
   0x6   :  { %s1225_s22 = smov [#allocation2]   ;;  %s41_s1 = sshll.u32 %s1516_s2, 4  ;;  %s42_s1 = int_to_ptr.hbm [resolvable:$true] %s41_s1 }
   0x7   :  { %s17_s23 = sshll.u32 %s1225_s22, 4  ;;  %s1226_s0 = smov [#allocation7]   ;;  %s18_s23 = int_to_ptr.vmem [resolvable:$true] %s17_s23 }
   0x8   :  { %23 = dma.hbm_to_vmem [thread:$0]  %s16_s19, 2048, %s18_s23, [#allocation3], %s1223_s20, %s1223_s20, %s1224_s21  }
   0x9   :  { %s43_s26 = sshll.u32 %s1226_s0, 4  ;;  %s1227_s27 = smov 64   ;;  %s44_s26 = int_to_ptr.vmem [resolvable:$true] %s43_s26 }
   0xa   :  { %s1228_s28 = smov 4  }
   0xb   :  { %49 = dma.hbm_to_vmem [thread:$0]  %s42_s1, 2048, %s44_s26, [#allocation6], %s1227_s27, %s1227_s27, %s1228_s28  }
   0xc   :  { %1216 = dma.done.wait [#allocation3], 2048  }
   0xd   :  { %1217 = vsyncadd [#allocation3], 4294965248 }
   0xe   :  { %1218 = dma.done.wait [#allocation6], 4096  }
   0xf   :  { %1219 = vsyncadd [#allocation6], 4294963200  ;;  %v975_v0 = vld [vmem:[#allocation5 + $0x70] sm:$0xf]  ;;  %v1060_v1 = vld [vmem:[#allocation5 + $0x74] sm:$0xf0] }
  0x10   :  { %v1059_v2 = vld [vmem:[#allocation5 + $0x74] sm:$0xf]  ;;  %v976_v3 = vor.u32 %v1060_v1, %v975_v0  ;;  %v977_v4 = vld [vmem:[#allocation5 + $0x78] sm:$0xf0]  ;;  %v967_v5 = vld [vmem:[#allocation5 + $0x60] sm:$0xf] }
  0x11   :  { %v1058_v6 = vld [vmem:[#allocation5 + $0x64] sm:$0xf0]  ;;  %v980_v7 = vor.u32 %v1059_v2, %v977_v4  ;;  %v1057_v8 = vld [vmem:[#allocation5 + $0x64] sm:$0xf]  ;;  %v969_v9 = vld [vmem:[#allocation5 + $0x68] sm:$0xf0] }
  0x12   :  { %214 = vmatpush.bf16.msra.mxu0 %v976_v3  ;;  %v968_v10 = vor.u32 %v1058_v6, %v967_v5  ;;  %v972_v11 = vor.u32 %v1057_v8, %v969_v9  ;;  %v959_v12 = vld [vmem:[#allocation5 + $0x50] sm:$0xf]  ;;  %v1056_v13 = vld [vmem:[#allocation5 + $0x54] sm:$0xf0]  ;;  %v1055_v14 = vld [vmem:[#allocation5 + $0x54] sm:$0xf] }
  0x13   :  { %263 = vmatpush.bf16.msra.mxu1 %v980_v7  ;;  %v961_v15 = vld [vmem:[#allocation5 + $0x58] sm:$0xf0]  ;;  %v960_v16 = vor.u32 %v1056_v13, %v959_v12  ;;  %v951_v18 = vld [vmem:[#allocation5 + $0x40] sm:$0xf]  ;;  %v1054_v19 = vld [vmem:[#allocation5 + $0x44] sm:$0xf0] }
  0x14   :  { %v964_v17 = vor.u32 %v1055_v14, %v961_v15  ;;  %v1053_v20 = vld [vmem:[#allocation5 + $0x44] sm:$0xf]  ;;  %v953_v21 = vld [vmem:[#allocation5 + $0x48] sm:$0xf0]  ;;  %v952_v22 = vor.u32 %v1054_v19, %v951_v18  ;;  %v943_v24 = vld [vmem:[#allocation5 + $0x30] sm:$0xf] }
  0x15   :  { %v956_v23 = vor.u32 %v1053_v20, %v953_v21  ;;  %v1052_v25 = vld [vmem:[#allocation5 + $0x34] sm:$0xf0]  ;;  %v1051_v26 = vld [vmem:[#allocation5 + $0x34] sm:$0xf]  ;;  %v945_v27 = vld [vmem:[#allocation5 + $0x38] sm:$0xf0] }
  0x16   :  { %215 = vmatpush.bf16.msra.mxu0 %v968_v10  ;;  %v944_v28 = vor.u32 %v1052_v25, %v943_v24  ;;  %v948_v29 = vor.u32 %v1051_v26, %v945_v27  ;;  %v935_v30 = vld [vmem:[#allocation5 + $0x20] sm:$0xf]  ;;  %v1050_v31 = vld [vmem:[#allocation5 + $0x24] sm:$0xf0]  ;;  %v1049_v32 = vld [vmem:[#allocation5 + $0x24] sm:$0xf] }
  0x17   :  { %264 = vmatpush.bf16.msra.mxu1 %v972_v11  ;;  %v937_v33 = vld [vmem:[#allocation5 + $0x28] sm:$0xf0]  ;;  %v936_v34 = vor.u32 %v1050_v31, %v935_v30  ;;  %v927_v36 = vld [vmem:[#allocation5 + $0x10] sm:$0xf]  ;;  %v1048_v37 = vld [vmem:[#allocation5 + $0x14] sm:$0xf0] }
  0x18   :  { %v940_v35 = vor.u32 %v1049_v32, %v937_v33  ;;  %v1047_v38 = vld [vmem:[#allocation5 + $0x14] sm:$0xf]  ;;  %v929_v39 = vld [vmem:[#allocation5 + $0x18] sm:$0xf0]  ;;  %v928_v40 = vor.u32 %v1048_v37, %v927_v36  ;;  %v919_v42 = vld [vmem:[#allocation5] sm:$0xf] }
  0x19   :  { %v932_v41 = vor.u32 %v1047_v38, %v929_v39  ;;  %v1046_v43 = vld [vmem:[#allocation5 + $0x4] sm:$0xf0]  ;;  %v1045_v44 = vld [vmem:[#allocation5 + $0x4] sm:$0xf]  ;;  %v921_v45 = vld [vmem:[#allocation5 + $0x8] sm:$0xf0] }
  0x1a   :  { %216 = vmatpush.bf16.msra.mxu0 %v960_v16  ;;  %v920_v46 = vor.u32 %v1046_v43, %v919_v42  ;;  %v1266_v47 = vld [vmem:[#allocation2] sm:$0xff]  ;;  %v1268_v48 = vld [vmem:[#allocation2 + $0x8] sm:$0xff]  ;;  %v924_v49 = vor.u32 %v1045_v44, %v921_v45  ;;  %v1272_v51 = vld [vmem:[#allocation2 + $0x10] sm:$0xff]  ;;  %s1230_s2 = smov [#allocation8]   ;;  %s903_s5 = sshll.u32 %s1517_s3, 4  ;;  %s904_s5 = int_to_ptr.hbm [resolvable:$true] %s903_s5 }
  0x1b   :  { %265 = vmatpush.bf16.msra.mxu1 %v964_v17  ;;  %v126_v50 = vpack.c.bf16 %v1268_v48, %v1266_v47  ;;  %v1274_v52 = vld [vmem:[#allocation2 + $0x18] sm:$0xff]  ;;  %v1278_v54 = vld [vmem:[#allocation2 + $0x20] sm:$0xff]  ;;  %v1280_v55 = vld [vmem:[#allocation2 + $0x28] sm:$0xff]  ;;  %s901_s29 = sshll.u32 %s1230_s2, 4  ;;  %s902_s29 = int_to_ptr.vmem [resolvable:$true] %s901_s29 }
  0x1c   :  { %v127_v53 = vpack.c.bf16 %v1274_v52, %v1272_v51  ;;  %v128_v56 = vpack.c.bf16 %v1280_v55, %v1278_v54  ;;  %v1284_v57 = vld [vmem:[#allocation2 + $0x30] sm:$0xff]  ;;  %v1286_v58 = vld [vmem:[#allocation2 + $0x38] sm:$0xff]  ;;  %v1290_v60 = vld [vmem:[#allocation2 + $0x40] sm:$0xff] }
  0x1d   :  { %v129_v59 = vpack.c.bf16 %v1286_v58, %v1284_v57  ;;  %v1292_v61 = vld [vmem:[#allocation2 + $0x48] sm:$0xff]  ;;  %v1068_v63 = vld [vmem:[#allocation7 + $0x38] sm:$0xff]  ;;  %v1067_v1 = vld [vmem:[#allocation7 + $0x30] sm:$0xff] }
  0x1e   :  { %217 = vmatpush.bf16.msra.mxu0 %v952_v22  ;;  %v130_v62 = vpack.c.bf16 %v1292_v61, %v1290_v60  ;;  %v1076_v0 = vld [vmem:[#allocation7 + $0x78] sm:$0xff]  ;;  %456 = vmatpush.bf16.msra.mxu2 %v1068_v63  ;;  %v1075_v2 = vld [vmem:[#allocation7 + $0x70] sm:$0xff]  ;;  %v1066_v6 = vld [vmem:[#allocation7 + $0x28] sm:$0xff] }
  0x1f   :  { %266 = vmatpush.bf16.msra.mxu1 %v956_v23  ;;  %505 = vmatpush.bf16.msra.mxu3 %v1076_v0  ;;  %v1296_v3 = vld [vmem:[#allocation2 + $0x50] sm:$0xff]  ;;  %v1298_v4 = vld [vmem:[#allocation2 + $0x58] sm:$0xff]  ;;  %v1074_v7 = vld [vmem:[#allocation7 + $0x68] sm:$0xff] }
  0x20   :  { %v131_v5 = vpack.c.bf16 %v1298_v4, %v1296_v3  ;;  %v1065_v8 = vld [vmem:[#allocation7 + $0x20] sm:$0xff]  ;;  %v1064_v10 = vld [vmem:[#allocation7 + $0x18] sm:$0xff]  ;;  %v1304_v13 = vld [vmem:[#allocation2 + $0x68] sm:$0xff] }
  0x21   :  { %v1073_v9 = vld [vmem:[#allocation7 + $0x60] sm:$0xff]  ;;  %v1072_v11 = vld [vmem:[#allocation7 + $0x58] sm:$0xff]  ;;  %v1063_v15 = vld [vmem:[#allocation7 + $0x10] sm:$0xff] }
  0x22   :  { %218 = vmatpush.bf16.msra.mxu0 %v944_v28  ;;  %457 = vmatpush.bf16.msra.mxu2 %v1067_v1  ;;  %v1302_v12 = vld [vmem:[#allocation2 + $0x60] sm:$0xff]  ;;  %v1071_v16 = vld [vmem:[#allocation7 + $0x50] sm:$0xff]  ;;  %v1062_v17 = vld [vmem:[#allocation7 + $0x8] sm:$0xff] }
  0x23   :  { %267 = vmatpush.bf16.msra.mxu1 %v948_v29  ;;  %506 = vmatpush.bf16.msra.mxu3 %v1075_v2  ;;  %v132_v14 = vpack.c.bf16 %v1304_v13, %v1302_v12  ;;  %v1070_v18 = vld [vmem:[#allocation7 + $0x48] sm:$0xff]  ;;  %v1061_v19 = vld [vmem:[#allocation7] sm:$0xff]  ;;  %v1308_v21 = vld [vmem:[#allocation2 + $0x70] sm:$0xff] }
  0x24   :  { %v1069_v20 = vld [vmem:[#allocation7 + $0x40] sm:$0xff]  ;;  %v1310_v22 = vld [vmem:[#allocation2 + $0x78] sm:$0xff] }
  0x25   :  { %v133_v23 = vpack.c.bf16 %v1310_v22, %v1308_v21 }
  0x26   :  { %219 = vmatpush.bf16.msra.mxu0 %v936_v34  ;;  %458 = vmatpush.bf16.msra.mxu2 %v1066_v6 }
  0x27   :  { %268 = vmatpush.bf16.msra.mxu1 %v940_v35  ;;  %507 = vmatpush.bf16.msra.mxu3 %v1074_v7 }
  0x2a   :  { %220 = vmatpush.bf16.msra.mxu0 %v928_v40  ;;  %459 = vmatpush.bf16.msra.mxu2 %v1065_v8 }
  0x2b   :  { %269 = vmatpush.bf16.msra.mxu1 %v932_v41  ;;  %508 = vmatpush.bf16.msra.mxu3 %v1073_v9 }
  0x2e   :  { %221 = vmatpush.bf16.msra.mxu0 %v920_v46  ;;  %460 = vmatpush.bf16.msra.mxu2 %v1064_v10 }
  0x2f   :  { %270 = vmatpush.bf16.msra.mxu1 %v924_v49  ;;  %509 = vmatpush.bf16.msra.mxu3 %v1072_v11 }
  0x31   :  { %222 = vmatmul.bf16.vlgmr.msra.gmra.mxu0 %v126_v50 }
  0x32   :  { %271 = vmatmul.bf16.vlgmr.msra.gmra.mxu1 %v126_v50  ;;  %461 = vmatpush.bf16.msra.mxu2 %v1063_v15 }
  0x33   :  { %510 = vmatpush.bf16.msra.mxu3 %v1071_v16 }
  0x36   :  { %462 = vmatpush.bf16.msra.mxu2 %v1062_v17 }
  0x37   :  { %511 = vmatpush.bf16.msra.mxu3 %v1070_v18 }
  0x3a   :  { %463 = vmatpush.bf16.msra.mxu2 %v1061_v19 }
  0x3b   :  { %512 = vmatpush.bf16.msra.mxu3 %v1069_v20 }
  0x41   :  { %227 = vmatmul.bf16.gmra.mxu0 %v127_v53 }
  0x42   :  { %276 = vmatmul.bf16.gmra.mxu1 %v127_v53 }
  0x51   :  { %232 = vmatmul.bf16.gmra.mxu0 %v128_v56 }
  0x52   :  { %281 = vmatmul.bf16.gmra.mxu1 %v128_v56 }
  0x61   :  { %237 = vmatmul.bf16.gmra.mxu0 %v129_v59 }
  0x62   :  { %286 = vmatmul.bf16.gmra.mxu1 %v129_v59 }
  0x71   :  { %242 = vmatmul.bf16.gmra.mxu0 %v130_v62 }
  0x72   :  { %291 = vmatmul.bf16.gmra.mxu1 %v130_v62 }
  0x81   :  { %247 = vmatmul.bf16.gmra.mxu0 %v131_v5 }
  0x82   :  { %296 = vmatmul.bf16.gmra.mxu1 %v131_v5 }
  0x91   :  { %252 = vmatmul.bf16.gmra.mxu0 %v132_v14 }
  0x92   :  { %301 = vmatmul.bf16.gmra.mxu1 %v132_v14 }
  0xa1   :  { %257 = vmatmul.bf16.gmra.mxu0 %v133_v23 }
  0xa2   :  { %306 = vmatmul.bf16.gmra.mxu1 %v133_v23 }
  0xae   :  { %v223_v24 = vpop.f32.mrf.mxu0 }
  0xaf   :  { %v272_v25 = vpop.f32.mrf.mxu1  ;;  %v312_v27 = vmax.f32 %v223_v24, 0.0 }
  0xb0   :  { %v313_v30 = vmax.f32 %v272_v25, 0.0 }
  0xb6   :  { %v225_v26 = vpop.f32.mrf.mxu0 }
  0xb7   :  { %v314_v28 = vmax.f32 %v225_v26, 0.0  ;;  %v274_v29 = vpop.f32.mrf.mxu1 }
  0xb8   :  { %v315_v31 = vmax.f32 %v274_v29, 0.0 }
  0xb9   :  { %v344_v32 = vpack.c.bf16 %v314_v28, %v312_v27 }
  0xba   :  { %v345_v33 = vpack.c.bf16 %v315_v31, %v313_v30 }
  0xbb   :  { %464 = vmatmul.bf16.vlgmr.msra.gmra.mxu2 %v344_v32 }
  0xbc   :  { %513 = vmatmul.bf16.vlgmr.msra.gmra.mxu3 %v345_v33 }
  0xbe   :  { %v228_v34 = vpop.f32.mrf.mxu0 }
  0xbf   :  { %v277_v35 = vpop.f32.mrf.mxu1  ;;  %v316_v37 = vmax.f32 %v228_v34, 0.0 }
  0xc0   :  { %v317_v40 = vmax.f32 %v277_v35, 0.0 }
  0xc6   :  { %v230_v36 = vpop.f32.mrf.mxu0 }
  0xc7   :  { %v318_v38 = vmax.f32 %v230_v36, 0.0  ;;  %v279_v39 = vpop.f32.mrf.mxu1 }
  0xc8   :  { %v319_v41 = vmax.f32 %v279_v39, 0.0 }
  0xc9   :  { %v346_v42 = vpack.c.bf16 %v318_v38, %v316_v37 }
  0xca   :  { %v347_v43 = vpack.c.bf16 %v319_v41, %v317_v40 }
  0xcb   :  { %469 = vmatmul.bf16.gmra.mxu2 %v346_v42 }
  0xcc   :  { %518 = vmatmul.bf16.gmra.mxu3 %v347_v43 }
  0xce   :  { %v233_v44 = vpop.f32.mrf.mxu0 }
  0xcf   :  { %v282_v45 = vpop.f32.mrf.mxu1  ;;  %v320_v49 = vmax.f32 %v233_v44, 0.0 }
  0xd0   :  { %v321_v56 = vmax.f32 %v282_v45, 0.0 }
  0xd6   :  { %v235_v46 = vpop.f32.mrf.mxu0 }
  0xd7   :  { %v322_v50 = vmax.f32 %v235_v46, 0.0  ;;  %v284_v53 = vpop.f32.mrf.mxu1 }
  0xd8   :  { %v323_v59 = vmax.f32 %v284_v53, 0.0 }
  0xd9   :  { %v348_v62 = vpack.c.bf16 %v322_v50, %v320_v49 }
  0xda   :  { %v349_v63 = vpack.c.bf16 %v323_v59, %v321_v56 }
  0xdb   :  { %474 = vmatmul.bf16.gmra.mxu2 %v348_v62 }
  0xdc   :  { %523 = vmatmul.bf16.gmra.mxu3 %v349_v63 }
  0xde   :  { %v238_v0 = vpop.f32.mrf.mxu0 }
  0xdf   :  { %v287_v1 = vpop.f32.mrf.mxu1  ;;  %v324_v5 = vmax.f32 %v238_v0, 0.0 }
  0xe0   :  { %v325_v8 = vmax.f32 %v287_v1, 0.0 }
  0xe6   :  { %v240_v2 = vpop.f32.mrf.mxu0 }
  0xe7   :  { %v326_v6 = vmax.f32 %v240_v2, 0.0  ;;  %v289_v7 = vpop.f32.mrf.mxu1 }
  0xe8   :  { %v327_v9 = vmax.f32 %v289_v7, 0.0 }
  0xe9   :  { %v350_v10 = vpack.c.bf16 %v326_v6, %v324_v5 }
  0xea   :  { %v351_v11 = vpack.c.bf16 %v327_v9, %v325_v8 }
  0xeb   :  { %479 = vmatmul.bf16.gmra.mxu2 %v350_v10 }
  0xec   :  { %528 = vmatmul.bf16.gmra.mxu3 %v351_v11 }
  0xee   :  { %v243_v14 = vpop.f32.mrf.mxu0 }
  0xef   :  { %v292_v15 = vpop.f32.mrf.mxu1  ;;  %v328_v17 = vmax.f32 %v243_v14, 0.0 }
  0xf0   :  { %v329_v20 = vmax.f32 %v292_v15, 0.0 }
  0xf6   :  { %v245_v16 = vpop.f32.mrf.mxu0 }
  0xf7   :  { %v330_v18 = vmax.f32 %v245_v16, 0.0  ;;  %v294_v19 = vpop.f32.mrf.mxu1 }
  0xf8   :  { %v331_v23 = vmax.f32 %v294_v19, 0.0 }
  0xf9   :  { %v352_v24 = vpack.c.bf16 %v330_v18, %v328_v17 }
  0xfa   :  { %v353_v25 = vpack.c.bf16 %v331_v23, %v329_v20 }
  0xfb   :  { %484 = vmatmul.bf16.gmra.mxu2 %v352_v24 }
  0xfc   :  { %533 = vmatmul.bf16.gmra.mxu3 %v353_v25 }
  0xfe   :  { %v248_v26 = vpop.f32.mrf.mxu0 }
  0xff   :  { %v297_v27 = vpop.f32.mrf.mxu1  ;;  %v332_v29 = vmax.f32 %v248_v26, 0.0 }
 0x100   :  { %v333_v32 = vmax.f32 %v297_v27, 0.0 }
 0x106   :  { %v250_v28 = vpop.f32.mrf.mxu0 }
 0x107   :  { %v334_v30 = vmax.f32 %v250_v28, 0.0  ;;  %v299_v31 = vpop.f32.mrf.mxu1 }
 0x108   :  { %v335_v33 = vmax.f32 %v299_v31, 0.0 }
 0x109   :  { %v354_v34 = vpack.c.bf16 %v334_v30, %v332_v29 }
 0x10a   :  { %v355_v35 = vpack.c.bf16 %v335_v33, %v333_v32 }
 0x10b   :  { %489 = vmatmul.bf16.gmra.mxu2 %v354_v34 }
 0x10c   :  { %538 = vmatmul.bf16.gmra.mxu3 %v355_v35 }
 0x10e   :  { %v253_v36 = vpop.f32.mrf.mxu0 }
 0x10f   :  { %v302_v37 = vpop.f32.mrf.mxu1  ;;  %v336_v39 = vmax.f32 %v253_v36, 0.0 }
 0x110   :  { %v337_v42 = vmax.f32 %v302_v37, 0.0 }
 0x116   :  { %v255_v38 = vpop.f32.mrf.mxu0 }
 0x117   :  { %v338_v40 = vmax.f32 %v255_v38, 0.0  ;;  %v304_v41 = vpop.f32.mrf.mxu1 }
 0x118   :  { %v339_v43 = vmax.f32 %v304_v41, 0.0 }
 0x119   :  { %v356_v44 = vpack.c.bf16 %v338_v40, %v336_v39 }
 0x11a   :  { %v357_v45 = vpack.c.bf16 %v339_v43, %v337_v42 }
 0x11b   :  { %494 = vmatmul.bf16.gmra.mxu2 %v356_v44 }
 0x11c   :  { %543 = vmatmul.bf16.gmra.mxu3 %v357_v45 }
 0x11e   :  { %v258_v46 = vpop.f32.mrf.mxu0 }
 0x11f   :  { %v307_v49 = vpop.f32.mrf.mxu1  ;;  %v340_v53 = vmax.f32 %v258_v46, 0.0 }
 0x120   :  { %v341_v62 = vmax.f32 %v307_v49, 0.0 }
 0x126   :  { %v260_v50 = vpop.f32.mrf.mxu0 }
 0x127   :  { %v342_v56 = vmax.f32 %v260_v50, 0.0  ;;  %v309_v59 = vpop.f32.mrf.mxu1 }
 0x128   :  { %v343_v63 = vmax.f32 %v309_v59, 0.0 }
 0x129   :  { %v358_v0 = vpack.c.bf16 %v342_v56, %v340_v53 }
 0x12a   :  { %v359_v1 = vpack.c.bf16 %v343_v63, %v341_v62 }
 0x12b   :  { %499 = vmatmul.bf16.gmra.mxu2 %v358_v0 }
 0x12c   :  { %548 = vmatmul.bf16.gmra.mxu3 %v359_v1 }
 0x13e   :  { %v465_v2 = vpop.f32.mrf.mxu2 }
 0x13f   :  { %v466_v5 = vadd.f32 %v465_v2, %v1266_v47  ;;  %v514_v6 = vpop.f32.mrf.mxu3 }
 0x141   :  { %v1315_v7 = vadd.f32 %v514_v6, %v466_v5 }
 0x143   :  { %554 = vadd.xlane.f32.xlu0 %v1315_v7 }
 0x146   :  { %v467_v8 = vpop.f32.mrf.mxu2 }
 0x147   :  { %v468_v9 = vadd.f32 %v467_v8, %v1268_v48  ;;  %v516_v10 = vpop.f32.mrf.mxu3 }
 0x149   :  { %v1319_v11 = vadd.f32 %v516_v10, %v468_v9 }
 0x14b   :  { %556 = vadd.xlane.f32.xlu0 %v1319_v11 }
 0x14e   :  { %v470_v14 = vpop.f32.mrf.mxu2 }
 0x14f   :  { %v471_v15 = vadd.f32 %v470_v14, %v1272_v51  ;;  %v519_v16 = vpop.f32.mrf.mxu3 }
 0x151   :  { %v1323_v17 = vadd.f32 %v519_v16, %v471_v15 }
 0x153   :  { %558 = vadd.xlane.f32.xlu1 %v1323_v17 }
 0x156   :  { %v472_v47 = vpop.f32.mrf.mxu2 }
 0x157   :  { %v473_v18 = vadd.f32 %v472_v47, %v1274_v52  ;;  %v521_v19 = vpop.f32.mrf.mxu3 }
 0x159   :  { %v1327_v20 = vadd.f32 %v521_v19, %v473_v18 }
 0x15b   :  { %560 = vadd.xlane.f32.xlu1 %v1327_v20 }
 0x15e   :  { %v475_v48 = vpop.f32.mrf.mxu2 }
 0x15f   :  { %v476_v23 = vadd.f32 %v475_v48, %v1278_v54  ;;  %v524_v24 = vpop.f32.mrf.mxu3 }
 0x161   :  { %v1331_v25 = vadd.f32 %v524_v24, %v476_v23 }
 0x163   :  { %562 = vadd.xlane.f32.xlu2 %v1331_v25 }
 0x166   :  { %v477_v51 = vpop.f32.mrf.mxu2 }
 0x167   :  { %v478_v26 = vadd.f32 %v477_v51, %v1280_v55  ;;  %v526_v27 = vpop.f32.mrf.mxu3 }
 0x169   :  { %v1335_v28 = vadd.f32 %v526_v27, %v478_v26 }
 0x16b   :  { %564 = vadd.xlane.f32.xlu2 %v1335_v28 }
 0x16e   :  { %v480_v52 = vpop.f32.mrf.mxu2 }
 0x16f   :  { %v481_v29 = vadd.f32 %v480_v52, %v1284_v57  ;;  %v529_v30 = vpop.f32.mrf.mxu3 }
 0x171   :  { %v1339_v31 = vadd.f32 %v529_v30, %v481_v29 }
 0x173   :  { %566 = vadd.xlane.f32.xlu0 %v1339_v31 }
 0x176   :  { %v482_v54 = vpop.f32.mrf.mxu2 }
 0x177   :  { %v483_v32 = vadd.f32 %v482_v54, %v1286_v58  ;;  %v531_v33 = vpop.f32.mrf.mxu3 }
 0x179   :  { %v1343_v34 = vadd.f32 %v531_v33, %v483_v32 }
 0x17b   :  { %568 = vadd.xlane.f32.xlu1 %v1343_v34 }
 0x17e   :  { %v485_v55 = vpop.f32.mrf.mxu2 }
 0x17f   :  { %v486_v35 = vadd.f32 %v485_v55, %v1290_v60  ;;  %v534_v36 = vpop.f32.mrf.mxu3 }
 0x181   :  { %v1347_v37 = vadd.f32 %v534_v36, %v486_v35 }
 0x183   :  { %570 = vadd.xlane.f32.xlu2 %v1347_v37 }
 0x186   :  { %v487_v57 = vpop.f32.mrf.mxu2 }
 0x187   :  { %v488_v38 = vadd.f32 %v487_v57, %v1292_v61  ;;  %v536_v39 = vpop.f32.mrf.mxu3  ;;  %v1229_v61 = vmov 128.0  }
 0x188   :  { %1086 = vrcp.f32 %v1229_v61 }
 0x189   :  { %v1351_v40 = vadd.f32 %v536_v39, %v488_v38 }
 0x18b   :  { %572 = vadd.xlane.f32.xlu0 %v1351_v40 }
 0x18e   :  { %v490_v58 = vpop.f32.mrf.mxu2 }
 0x18f   :  { %v491_v41 = vadd.f32 %v490_v58, %v1296_v3  ;;  %v539_v42 = vpop.f32.mrf.mxu3  ;;  %v1087_v3 = vpop.eup %1086 }
 0x190   :  { %v587_v59 = vmul.f32 128.0, %v1087_v3  ;;  %vm591_vm0 = vweird.f32 %v1087_v3 }
 0x191   :  { %v1355_v43 = vadd.f32 %v539_v42, %v491_v41 }
 0x192   :  { %v588_v0 = vsub.f32 1.0, %v587_v59 }
 0x193   :  { %574 = vadd.xlane.f32.xlu1 %v1355_v43 }
 0x194   :  { %v589_v2 = vmul.f32 %v1087_v3, %v588_v0 }
 0x196   :  { %v492_v60 = vpop.f32.mrf.mxu2  ;;  %v590_v8 = vadd.f32 %v1087_v3, %v589_v2 }
 0x197   :  { %v493_v44 = vadd.f32 %v492_v60, %v1298_v4  ;;  %v541_v45 = vpop.f32.mrf.mxu3 }
 0x198   :  { %v1374_v10 = vsel %vm591_vm0, %v1087_v3, %v590_v8 }
 0x199   :  { %v1359_v46 = vadd.f32 %v541_v45, %v493_v44 }
 0x19b   :  { %576 = vadd.xlane.f32.xlu2 %v1359_v46 }
 0x19e   :  { %v495_v49 = vpop.f32.mrf.mxu2 }
 0x19f   :  { %v496_v50 = vadd.f32 %v495_v49, %v1302_v12  ;;  %v544_v53 = vpop.f32.mrf.mxu3 }
 0x1a1   :  { %v1363_v56 = vadd.f32 %v544_v53, %v496_v50 }
 0x1a3   :  { %578 = vadd.xlane.f32.xlu0 %v1363_v56 }
 0x1a6   :  { %v497_v62 = vpop.f32.mrf.mxu2 }
 0x1a7   :  { %v498_v4 = vadd.f32 %v497_v62, %v1304_v13  ;;  %v546_v63 = vpop.f32.mrf.mxu3 }
 0x1a9   :  { %v1367_v1 = vadd.f32 %v546_v63, %v498_v4 }
 0x1ab   :  { %580 = vadd.xlane.f32.xlu1 %v1367_v1 }
 0x1ae   :  { %v500_v5 = vpop.f32.mrf.mxu2 }
 0x1af   :  { %v501_v12 = vadd.f32 %v500_v5, %v1308_v21  ;;  %v549_v6 = vpop.f32.mrf.mxu3 }
 0x1b1   :  { %v1371_v9 = vadd.f32 %v549_v6, %v501_v12 }
 0x1b3   :  { %582 = vadd.xlane.f32.xlu2 %v1371_v9 }
 0x1b6   :  { %v555_v13 = vpop.xlane.xlu0 %554  ;;  %v502_v14 = vpop.f32.mrf.mxu2 }
 0x1b7   :  { %v593_v15 = vmul.f32 %v1374_v10, %v555_v13  ;;  %v503_v16 = vadd.f32 %v502_v14, %v1310_v22  ;;  %v551_v47 = vpop.f32.mrf.mxu3 }
 0x1b9   :  { %v1379_v18 = vsub.f32 %v1315_v7, %v593_v15  ;;  %v1381_v21 = vadd.f32 %v551_v47, %v503_v16 }
 0x1bb   :  { %584 = vadd.xlane.f32.xlu0 %v1381_v21  ;;  %v625_v19 = vmul.f32 %v1379_v18, %v1379_v18 }
 0x1bd   :  { %641 = vadd.xlane.f32.xlu1 %v625_v19 }
 0x1be   :  { %v557_v48 = vpop.xlane.xlu0 %556 }
 0x1bf   :  { %v594_v23 = vmul.f32 %v1374_v10, %v557_v48 }
 0x1c1   :  { %v1388_v24 = vsub.f32 %v1319_v11, %v594_v23 }
 0x1c3   :  { %v626_v22 = vmul.f32 %v1388_v24, %v1388_v24 }
 0x1c5   :  { %643 = vadd.xlane.f32.xlu2 %v626_v22 }
 0x1c6   :  { %v559_v7 = vpop.xlane.xlu1 %558 }
 0x1c7   :  { %v595_v51 = vmul.f32 %v1374_v10, %v559_v7 }
 0x1c9   :  { %v1394_v26 = vsub.f32 %v1323_v17, %v595_v51 }
 0x1cb   :  { %v627_v27 = vmul.f32 %v1394_v26, %v1394_v26 }
 0x1cd   :  { %645 = vadd.xlane.f32.xlu0 %v627_v27 }
 0x1ce   :  { %v561_v52 = vpop.xlane.xlu1 %560 }
 0x1cf   :  { %v596_v29 = vmul.f32 %v1374_v10, %v561_v52 }
 0x1d1   :  { %v1400_v11 = vsub.f32 %v1327_v20, %v596_v29 }
 0x1d3   :  { %v628_v30 = vmul.f32 %v1400_v11, %v1400_v11 }
 0x1d5   :  { %647 = vadd.xlane.f32.xlu1 %v628_v30 }
 0x1d6   :  { %v563_v54 = vpop.xlane.xlu2 %562 }
 0x1d7   :  { %v597_v32 = vmul.f32 %v1374_v10, %v563_v54 }
 0x1d9   :  { %v1406_v17 = vsub.f32 %v1331_v25, %v597_v32 }
 0x1db   :  { %v629_v33 = vmul.f32 %v1406_v17, %v1406_v17 }
 0x1dd   :  { %649 = vadd.xlane.f32.xlu2 %v629_v33 }
 0x1de   :  { %v565_v55 = vpop.xlane.xlu2 %564 }
 0x1df   :  { %v598_v35 = vmul.f32 %v1374_v10, %v565_v55 }
 0x1e1   :  { %v1412_v20 = vsub.f32 %v1335_v28, %v598_v35 }
 0x1e3   :  { %v630_v36 = vmul.f32 %v1412_v20, %v1412_v20 }
 0x1e5   :  { %651 = vadd.xlane.f32.xlu0 %v630_v36 }
 0x1e6   :  { %v567_v57 = vpop.xlane.xlu0 %566 }
 0x1e7   :  { %v599_v38 = vmul.f32 %v1374_v10, %v567_v57 }
 0x1e9   :  { %v1418_v25 = vsub.f32 %v1339_v31, %v599_v38 }
 0x1eb   :  { %v631_v39 = vmul.f32 %v1418_v25, %v1418_v25 }
 0x1ed   :  { %653 = vadd.xlane.f32.xlu1 %v631_v39 }
 0x1ee   :  { %v569_v58 = vpop.xlane.xlu1 %568 }
 0x1ef   :  { %v600_v41 = vmul.f32 %v1374_v10, %v569_v58 }
 0x1f1   :  { %v1424_v28 = vsub.f32 %v1343_v34, %v600_v41 }
 0x1f3   :  { %v632_v42 = vmul.f32 %v1424_v28, %v1424_v28 }
 0x1f5   :  { %655 = vadd.xlane.f32.xlu2 %v632_v42 }
 0x1f6   :  { %v571_v60 = vpop.xlane.xlu2 %570 }
 0x1f7   :  { %v601_v44 = vmul.f32 %v1374_v10, %v571_v60 }
 0x1f9   :  { %v1430_v31 = vsub.f32 %v1347_v37, %v601_v44 }
 0x1fb   :  { %v633_v45 = vmul.f32 %v1430_v31, %v1430_v31 }
 0x1fd   :  { %657 = vadd.xlane.f32.xlu0 %v633_v45 }
 0x1fe   :  { %v573_v61 = vpop.xlane.xlu0 %572 }
 0x1ff   :  { %v602_v49 = vmul.f32 %v1374_v10, %v573_v61 }
 0x201   :  { %v1436_v34 = vsub.f32 %v1351_v40, %v602_v49 }
 0x203   :  { %v634_v50 = vmul.f32 %v1436_v34, %v1436_v34 }
 0x205   :  { %659 = vadd.xlane.f32.xlu1 %v634_v50 }
 0x206   :  { %v575_v53 = vpop.xlane.xlu1 %574 }
 0x207   :  { %v603_v3 = vmul.f32 %v1374_v10, %v575_v53 }
 0x209   :  { %v1442_v37 = vsub.f32 %v1355_v43, %v603_v3 }
 0x20b   :  { %v635_v59 = vmul.f32 %v1442_v37, %v1442_v37 }
 0x20d   :  { %661 = vadd.xlane.f32.xlu2 %v635_v59 }
 0x20e   :  { %v577_v62 = vpop.xlane.xlu2 %576 }
 0x20f   :  { %v604_v4 = vmul.f32 %v1374_v10, %v577_v62 }
 0x211   :  { %v1448_v40 = vsub.f32 %v1359_v46, %v604_v4 }
 0x213   :  { %v636_v63 = vmul.f32 %v1448_v40, %v1448_v40 }
 0x215   :  { %663 = vadd.xlane.f32.xlu0 %v636_v63 }
 0x216   :  { %v579_v0 = vpop.xlane.xlu0 %578 }
 0x217   :  { %v605_v2 = vmul.f32 %v1374_v10, %v579_v0 }
 0x219   :  { %v1454_v43 = vsub.f32 %v1363_v56, %v605_v2 }
 0x21b   :  { %v637_v5 = vmul.f32 %v1454_v43, %v1454_v43 }
 0x21d   :  { %665 = vadd.xlane.f32.xlu1 %v637_v5 }
 0x21e   :  { %v581_v12 = vpop.xlane.xlu1 %580 }
 0x21f   :  { %v606_v6 = vmul.f32 %v1374_v10, %v581_v12 }
 0x221   :  { %v1460_v46 = vsub.f32 %v1367_v1, %v606_v6 }
 0x223   :  { %v638_v8 = vmul.f32 %v1460_v46, %v1460_v46 }
 0x225   :  { %667 = vadd.xlane.f32.xlu2 %v638_v8 }
 0x226   :  { %v583_v13 = vpop.xlane.xlu2 %582 }
 0x227   :  { %v607_v14 = vmul.f32 %v1374_v10, %v583_v13 }
 0x229   :  { %v1466_v56 = vsub.f32 %v1371_v9, %v607_v14 }
 0x22b   :  { %v639_v15 = vmul.f32 %v1466_v56, %v1466_v56 }
 0x22d   :  { %669 = vadd.xlane.f32.xlu0 %v639_v15 }
 0x22e   :  { %v585_v16 = vpop.xlane.xlu0 %584 }
 0x22f   :  { %v608_v47 = vmul.f32 %v1374_v10, %v585_v16 }
 0x230   :  { %v642_v19 = vpop.xlane.xlu1 %641 }
 0x231   :  { %v1472_v1 = vsub.f32 %v1381_v21, %v608_v47  ;;  %v673_v48 = vmul.f32 %v642_v19, %v1374_v10 }
 0x233   :  { %v689_v23 = vadd.f32 1e-05, %v673_v48  ;;  %v640_v22 = vmul.f32 %v1472_v1, %v1472_v1 }
 0x235   :  { %1088 = vrsqrt.f32 %v689_v23  ;;  %671 = vadd.xlane.f32.xlu1 %v640_v22  ;;  %vm711_vm2 = vweird.f32 %v689_v23 }
 0x238   :  { %v644_v9 = vpop.xlane.xlu2 %643 }
 0x239   :  { %v674_v7 = vmul.f32 %v644_v9, %v1374_v10 }
 0x23b   :  { %v1089_v51 = vpop.eup %1088  ;;  %v690_v27 = vadd.f32 1e-05, %v674_v7 }
 0x23c   :  { %v706_v52 = vmul.f32 %v1089_v51, %v689_v23  ;;  %vm712_vm1 = vweird.f32 %v1089_v51 }
 0x23d   :  { %1090 = vrsqrt.f32 %v690_v27  ;;  %vm713_vm3 = vmor %vm711_vm2, %vm712_vm1  ;;  %vm721_vm5 = vweird.f32 %v690_v27 }
 0x23e   :  { %v707_v29 = vmul.f32 %v1089_v51, %v706_v52 }
 0x240   :  { %v708_v30 = vmul.f32 0.5, %v707_v29  ;;  %v646_v54 = vpop.xlane.xlu0 %645 }
 0x241   :  { %v675_v21 = vmul.f32 %v646_v54, %v1374_v10 }
 0x242   :  { %v709_v32 = vsub.f32 1.5, %v708_v30 }
 0x243   :  { %v1091_v33 = vpop.eup %1090  ;;  %v691_v55 = vadd.f32 1e-05, %v675_v21 }
 0x244   :  { %v710_v35 = vmul.f32 %v1089_v51, %v709_v32  ;;  %v716_v36 = vmul.f32 %v1091_v33, %v690_v27  ;;  %vm722_vm4 = vweird.f32 %v1091_v33 }
 0x245   :  { %1092 = vrsqrt.f32 %v691_v55  ;;  %vm723_vm6 = vmor %vm721_vm5, %vm722_vm4  ;;  %vm731_vm8 = vweird.f32 %v691_v55 }
 0x246   :  { %v714_v57 = vsel %vm713_vm3, %v1089_v51, %v710_v35  ;;  %v717_v38 = vmul.f32 %v1091_v33, %v716_v36 }
 0x247   :  { %v865_v39 = vmul.f32 %v714_v57, %v1379_v18 }
 0x248   :  { %v718_v58 = vmul.f32 0.5, %v717_v38  ;;  %v648_v41 = vpop.xlane.xlu1 %647 }
 0x249   :  { %881 = vst [vmem:[#allocation8] sm:$0xff] %v865_v39  ;;  %v676_v42 = vmul.f32 %v648_v41, %v1374_v10 }
 0x24a   :  { %v719_v60 = vsub.f32 1.5, %v718_v58 }
 0x24b   :  { %v1093_v44 = vpop.eup %1092  ;;  %v692_v45 = vadd.f32 1e-05, %v676_v42 }
 0x24c   :  { %v720_v61 = vmul.f32 %v1091_v33, %v719_v60  ;;  %v726_v49 = vmul.f32 %v1093_v44, %v691_v55  ;;  %vm732_vm7 = vweird.f32 %v1093_v44 }
 0x24d   :  { %1094 = vrsqrt.f32 %v692_v45  ;;  %vm733_vm9 = vmor %vm731_vm8, %vm732_vm7  ;;  %vm741_vm11 = vweird.f32 %v692_v45 }
 0x24e   :  { %v724_v50 = vsel %vm723_vm6, %v1091_v33, %v720_v61  ;;  %v727_v53 = vmul.f32 %v1093_v44, %v726_v49 }
 0x24f   :  { %v866_v3 = vmul.f32 %v724_v50, %v1388_v24 }
 0x250   :  { %v728_v59 = vmul.f32 0.5, %v727_v53  ;;  %v650_v18 = vpop.xlane.xlu2 %649 }
 0x251   :  { %882 = vst [vmem:[#allocation8 + $0x8] sm:$0xff] %v866_v3  ;;  %v677_v62 = vmul.f32 %v650_v18, %v1374_v10 }
 0x252   :  { %v729_v4 = vsub.f32 1.5, %v728_v59 }
 0x253   :  { %v1095_v63 = vpop.eup %1094  ;;  %v693_v0 = vadd.f32 1e-05, %v677_v62 }
 0x254   :  { %v730_v2 = vmul.f32 %v1093_v44, %v729_v4  ;;  %v736_v5 = vmul.f32 %v1095_v63, %v692_v45  ;;  %vm742_vm10 = vweird.f32 %v1095_v63 }
 0x255   :  { %1096 = vrsqrt.f32 %v693_v0  ;;  %vm743_vm12 = vmor %vm741_vm11, %vm742_vm10  ;;  %vm751_vm14 = vweird.f32 %v693_v0 }
 0x256   :  { %v734_v12 = vsel %vm733_vm9, %v1093_v44, %v730_v2  ;;  %v737_v6 = vmul.f32 %v1095_v63, %v736_v5 }
 0x257   :  { %v867_v8 = vmul.f32 %v734_v12, %v1394_v26 }
 0x258   :  { %v738_v13 = vmul.f32 0.5, %v737_v6  ;;  %v652_v24 = vpop.xlane.xlu0 %651 }
 0x259   :  { %883 = vst [vmem:[#allocation8 + $0x10] sm:$0xff] %v867_v8  ;;  %v678_v14 = vmul.f32 %v652_v24, %v1374_v10 }
 0x25a   :  { %v739_v15 = vsub.f32 1.5, %v738_v13 }
 0x25b   :  { %v1097_v16 = vpop.eup %1096  ;;  %v694_v47 = vadd.f32 1e-05, %v678_v14 }
 0x25c   :  { %v740_v19 = vmul.f32 %v1095_v63, %v739_v15  ;;  %v746_v48 = vmul.f32 %v1097_v16, %v693_v0  ;;  %vm752_vm13 = vweird.f32 %v1097_v16 }
 0x25d   :  { %1098 = vrsqrt.f32 %v694_v47  ;;  %vm753_vm15 = vmor %vm751_vm14, %vm752_vm13  ;;  %vm761_vm1 = vweird.f32 %v694_v47 }
 0x25e   :  { %v744_v23 = vsel %vm743_vm12, %v1095_v63, %v740_v19  ;;  %v747_v22 = vmul.f32 %v1097_v16, %v746_v48 }
 0x25f   :  { %v868_v9 = vmul.f32 %v744_v23, %v1400_v11 }
 0x260   :  { %v748_v7 = vmul.f32 0.5, %v747_v22  ;;  %v654_v26 = vpop.xlane.xlu1 %653 }
 0x261   :  { %884 = vst [vmem:[#allocation8 + $0x18] sm:$0xff] %v868_v9  ;;  %v679_v51 = vmul.f32 %v654_v26, %v1374_v10 }
 0x262   :  { %v749_v27 = vsub.f32 1.5, %v748_v7 }
 0x263   :  { %v1099_v52 = vpop.eup %1098  ;;  %v695_v29 = vadd.f32 1e-05, %v679_v51 }
 0x264   :  { %v750_v30 = vmul.f32 %v1097_v16, %v749_v27  ;;  %v756_v54 = vmul.f32 %v1099_v52, %v694_v47  ;;  %vm762_vm0 = vweird.f32 %v1099_v52 }
 0x265   :  { %1100 = vrsqrt.f32 %v695_v29  ;;  %vm763_vm2 = vmor %vm761_vm1, %vm762_vm0  ;;  %vm771_vm4 = vweird.f32 %v695_v29 }
 0x266   :  { %v754_v21 = vsel %vm753_vm15, %v1097_v16, %v750_v30  ;;  %v757_v32 = vmul.f32 %v1099_v52, %v756_v54 }
 0x267   :  { %v869_v33 = vmul.f32 %v754_v21, %v1406_v17 }
 0x268   :  { %v758_v55 = vmul.f32 0.5, %v757_v32  ;;  %v656_v11 = vpop.xlane.xlu2 %655 }
 0x269   :  { %885 = vst [vmem:[#allocation8 + $0x20] sm:$0xff] %v869_v33  ;;  %v680_v35 = vmul.f32 %v656_v11, %v1374_v10 }
 0x26a   :  { %v759_v36 = vsub.f32 1.5, %v758_v55 }
 0x26b   :  { %v1101_v57 = vpop.eup %1100  ;;  %v696_v38 = vadd.f32 1e-05, %v680_v35 }
 0x26c   :  { %v760_v39 = vmul.f32 %v1099_v52, %v759_v36  ;;  %v766_v58 = vmul.f32 %v1101_v57, %v695_v29  ;;  %vm772_vm3 = vweird.f32 %v1101_v57 }
 0x26d   :  { %1102 = vrsqrt.f32 %v696_v38  ;;  %vm773_vm5 = vmor %vm771_vm4, %vm772_vm3  ;;  %vm781_vm7 = vweird.f32 %v696_v38 }
 0x26e   :  { %v764_v41 = vsel %vm763_vm2, %v1099_v52, %v760_v39  ;;  %v767_v42 = vmul.f32 %v1101_v57, %v766_v58 }
 0x26f   :  { %v870_v60 = vmul.f32 %v764_v41, %v1412_v20 }
 0x270   :  { %v768_v44 = vmul.f32 0.5, %v767_v42  ;;  %v658_v17 = vpop.xlane.xlu0 %657 }
 0x271   :  { %886 = vst [vmem:[#allocation8 + $0x28] sm:$0xff] %v870_v60  ;;  %v681_v45 = vmul.f32 %v658_v17, %v1374_v10 }
 0x272   :  { %v769_v61 = vsub.f32 1.5, %v768_v44 }
 0x273   :  { %v1103_v49 = vpop.eup %1102  ;;  %v697_v50 = vadd.f32 1e-05, %v681_v45 }
 0x274   :  { %v770_v53 = vmul.f32 %v1101_v57, %v769_v61  ;;  %v776_v3 = vmul.f32 %v1103_v49, %v696_v38  ;;  %vm782_vm6 = vweird.f32 %v1103_v49 }
 0x275   :  { %1104 = vrsqrt.f32 %v697_v50  ;;  %vm783_vm8 = vmor %vm781_vm7, %vm782_vm6  ;;  %vm791_vm10 = vweird.f32 %v697_v50 }
 0x276   :  { %v774_v59 = vsel %vm773_vm5, %v1101_v57, %v770_v53  ;;  %v777_v18 = vmul.f32 %v1103_v49, %v776_v3 }
 0x277   :  { %v871_v62 = vmul.f32 %v774_v59, %v1418_v25 }
 0x278   :  { %v778_v4 = vmul.f32 0.5, %v777_v18  ;;  %v660_v20 = vpop.xlane.xlu1 %659 }
 0x279   :  { %887 = vst [vmem:[#allocation8 + $0x30] sm:$0xff] %v871_v62  ;;  %v682_v63 = vmul.f32 %v660_v20, %v1374_v10 }
 0x27a   :  { %v779_v0 = vsub.f32 1.5, %v778_v4 }
 0x27b   :  { %v1105_v2 = vpop.eup %1104  ;;  %v698_v5 = vadd.f32 1e-05, %v682_v63 }
 0x27c   :  { %v780_v12 = vmul.f32 %v1103_v49, %v779_v0  ;;  %v786_v6 = vmul.f32 %v1105_v2, %v697_v50  ;;  %vm792_vm9 = vweird.f32 %v1105_v2 }
 0x27d   :  { %1106 = vrsqrt.f32 %v698_v5  ;;  %vm793_vm11 = vmor %vm791_vm10, %vm792_vm9  ;;  %vm801_vm13 = vweird.f32 %v698_v5 }
 0x27e   :  { %v784_v8 = vsel %vm783_vm8, %v1103_v49, %v780_v12  ;;  %v787_v13 = vmul.f32 %v1105_v2, %v786_v6 }
 0x27f   :  { %v872_v24 = vmul.f32 %v784_v8, %v1424_v28 }
 0x280   :  { %v788_v14 = vmul.f32 0.5, %v787_v13  ;;  %v662_v25 = vpop.xlane.xlu2 %661 }
 0x281   :  { %888 = vst [vmem:[#allocation8 + $0x38] sm:$0xff] %v872_v24  ;;  %v683_v15 = vmul.f32 %v662_v25, %v1374_v10 }
 0x282   :  { %v789_v16 = vsub.f32 1.5, %v788_v14 }
 0x283   :  { %v1107_v47 = vpop.eup %1106  ;;  %v699_v19 = vadd.f32 1e-05, %v683_v15 }
 0x284   :  { %v790_v48 = vmul.f32 %v1105_v2, %v789_v16  ;;  %v796_v23 = vmul.f32 %v1107_v47, %v698_v5  ;;  %vm802_vm12 = vweird.f32 %v1107_v47 }
 0x285   :  { %1108 = vrsqrt.f32 %v699_v19  ;;  %vm803_vm14 = vmor %vm801_vm13, %vm802_vm12  ;;  %vm811_vm0 = vweird.f32 %v699_v19 }
 0x286   :  { %v794_v22 = vsel %vm793_vm11, %v1105_v2, %v790_v48  ;;  %v797_v9 = vmul.f32 %v1107_v47, %v796_v23 }
 0x287   :  { %v873_v7 = vmul.f32 %v794_v22, %v1430_v31 }
 0x288   :  { %v798_v26 = vmul.f32 0.5, %v797_v9  ;;  %v664_v28 = vpop.xlane.xlu0 %663 }
 0x289   :  { %889 = vst [vmem:[#allocation8 + $0x40] sm:$0xff] %v873_v7  ;;  %v684_v51 = vmul.f32 %v664_v28, %v1374_v10 }
 0x28a   :  { %v799_v27 = vsub.f32 1.5, %v798_v26 }
 0x28b   :  { %v1109_v52 = vpop.eup %1108  ;;  %v700_v29 = vadd.f32 1e-05, %v684_v51 }
 0x28c   :  { %v800_v30 = vmul.f32 %v1107_v47, %v799_v27  ;;  %v806_v54 = vmul.f32 %v1109_v52, %v699_v19  ;;  %vm812_vm15 = vweird.f32 %v1109_v52 }
 0x28d   :  { %1110 = vrsqrt.f32 %v700_v29  ;;  %vm813_vm1 = vmor %vm811_vm0, %vm812_vm15  ;;  %vm821_vm3 = vweird.f32 %v700_v29 }
 0x28e   :  { %v804_v21 = vsel %vm803_vm14, %v1107_v47, %v800_v30  ;;  %v807_v32 = vmul.f32 %v1109_v52, %v806_v54 }
 0x28f   :  { %v874_v33 = vmul.f32 %v804_v21, %v1436_v34 }
 0x290   :  { %v808_v55 = vmul.f32 0.5, %v807_v32  ;;  %v666_v31 = vpop.xlane.xlu1 %665 }
 0x291   :  { %890 = vst [vmem:[#allocation8 + $0x48] sm:$0xff] %v874_v33  ;;  %v685_v11 = vmul.f32 %v666_v31, %v1374_v10 }
 0x292   :  { %v809_v35 = vsub.f32 1.5, %v808_v55 }
 0x293   :  { %v1111_v36 = vpop.eup %1110  ;;  %v701_v57 = vadd.f32 1e-05, %v685_v11 }
 0x294   :  { %v810_v38 = vmul.f32 %v1109_v52, %v809_v35  ;;  %v816_v39 = vmul.f32 %v1111_v36, %v700_v29  ;;  %vm822_vm2 = vweird.f32 %v1111_v36 }
 0x295   :  { %1112 = vrsqrt.f32 %v701_v57  ;;  %vm823_vm4 = vmor %vm821_vm3, %vm822_vm2  ;;  %vm831_vm6 = vweird.f32 %v701_v57 }
 0x296   :  { %v814_v58 = vsel %vm813_vm1, %v1109_v52, %v810_v38  ;;  %v817_v41 = vmul.f32 %v1111_v36, %v816_v39 }
 0x297   :  { %v875_v42 = vmul.f32 %v814_v58, %v1442_v37 }
 0x298   :  { %v818_v60 = vmul.f32 0.5, %v817_v41  ;;  %v668_v34 = vpop.xlane.xlu2 %667 }
 0x299   :  { %891 = vst [vmem:[#allocation8 + $0x50] sm:$0xff] %v875_v42  ;;  %v686_v44 = vmul.f32 %v668_v34, %v1374_v10 }
 0x29a   :  { %v819_v17 = vsub.f32 1.5, %v818_v60 }
 0x29b   :  { %v1113_v45 = vpop.eup %1112  ;;  %v702_v61 = vadd.f32 1e-05, %v686_v44 }
 0x29c   :  { %v820_v49 = vmul.f32 %v1111_v36, %v819_v17  ;;  %v826_v50 = vmul.f32 %v1113_v45, %v701_v57  ;;  %vm832_vm5 = vweird.f32 %v1113_v45 }
 0x29d   :  { %1114 = vrsqrt.f32 %v702_v61  ;;  %vm833_vm7 = vmor %vm831_vm6, %vm832_vm5  ;;  %vm841_vm9 = vweird.f32 %v702_v61 }
 0x29e   :  { %v824_v53 = vsel %vm823_vm4, %v1111_v36, %v820_v49  ;;  %v827_v3 = vmul.f32 %v1113_v45, %v826_v50 }
 0x29f   :  { %v876_v59 = vmul.f32 %v824_v53, %v1448_v40 }
 0x2a0   :  { %v828_v18 = vmul.f32 0.5, %v827_v3  ;;  %v670_v37 = vpop.xlane.xlu0 %669 }
 0x2a1   :  { %892 = vst [vmem:[#allocation8 + $0x58] sm:$0xff] %v876_v59  ;;  %v687_v62 = vmul.f32 %v670_v37, %v1374_v10 }
 0x2a2   :  { %v829_v4 = vsub.f32 1.5, %v828_v18 }
 0x2a3   :  { %v1115_v20 = vpop.eup %1114  ;;  %v703_v63 = vadd.f32 1e-05, %v687_v62 }
 0x2a4   :  { %v830_v0 = vmul.f32 %v1113_v45, %v829_v4  ;;  %v836_v2 = vmul.f32 %v1115_v20, %v702_v61  ;;  %vm842_vm8 = vweird.f32 %v1115_v20 }
 0x2a5   :  { %1116 = vrsqrt.f32 %v703_v63  ;;  %vm843_vm10 = vmor %vm841_vm9, %vm842_vm8  ;;  %vm851_vm12 = vweird.f32 %v703_v63 }
 0x2a6   :  { %v834_v5 = vsel %vm833_vm7, %v1113_v45, %v830_v0  ;;  %v837_v12 = vmul.f32 %v1115_v20, %v836_v2 }
 0x2a7   :  { %v877_v6 = vmul.f32 %v834_v5, %v1454_v43 }
 0x2a8   :  { %v838_v8 = vmul.f32 0.5, %v837_v12  ;;  %v672_v40 = vpop.xlane.xlu1 %671 }
 0x2a9   :  { %893 = vst [vmem:[#allocation8 + $0x60] sm:$0xff] %v877_v6  ;;  %v688_v13 = vmul.f32 %v672_v40, %v1374_v10 }
 0x2aa   :  { %v839_v24 = vsub.f32 1.5, %v838_v8 }
 0x2ab   :  { %v1117_v14 = vpop.eup %1116  ;;  %v704_v25 = vadd.f32 1e-05, %v688_v13 }
 0x2ac   :  { %v840_v15 = vmul.f32 %v1115_v20, %v839_v24  ;;  %v846_v16 = vmul.f32 %v1117_v14, %v703_v63  ;;  %vm852_vm11 = vweird.f32 %v1117_v14 }
 0x2ad   :  { %1118 = vrsqrt.f32 %v704_v25  ;;  %vm853_vm13 = vmor %vm851_vm12, %vm852_vm11  ;;  %vm861_vm15 = vweird.f32 %v704_v25 }
 0x2ae   :  { %v844_v47 = vsel %vm843_vm10, %v1115_v20, %v840_v15  ;;  %v847_v19 = vmul.f32 %v1117_v14, %v846_v16 }
 0x2af   :  { %v878_v48 = vmul.f32 %v844_v47, %v1460_v46 }
 0x2b0   :  { %v848_v23 = vmul.f32 0.5, %v847_v19 }
 0x2b1   :  { %894 = vst [vmem:[#allocation8 + $0x68] sm:$0xff] %v878_v48 }
 0x2b2   :  { %v849_v43 = vsub.f32 1.5, %v848_v23 }
 0x2b3   :  { %v1119_v22 = vpop.eup %1118 }
 0x2b4   :  { %v850_v9 = vmul.f32 %v1117_v14, %v849_v43  ;;  %v856_v10 = vmul.f32 %v1119_v22, %v704_v25  ;;  %vm862_vm14 = vweird.f32 %v1119_v22 }
 0x2b5   :  { %vm863_vm0 = vmor %vm861_vm15, %vm862_vm14 }
 0x2b6   :  { %v854_v7 = vsel %vm853_vm13, %v1117_v14, %v850_v9  ;;  %v857_v26 = vmul.f32 %v1119_v22, %v856_v10 }
 0x2b7   :  { %v879_v28 = vmul.f32 %v854_v7, %v1466_v56 }
 0x2b8   :  { %v858_v51 = vmul.f32 0.5, %v857_v26 }
 0x2b9   :  { %895 = vst [vmem:[#allocation8 + $0x70] sm:$0xff] %v879_v28 }
 0x2ba   :  { %v859_v27 = vsub.f32 1.5, %v858_v51 }
 0x2bc   :  { %v860_v52 = vmul.f32 %v1119_v22, %v859_v27 }
 0x2be   :  { %v864_v46 = vsel %vm863_vm0, %v1119_v22, %v860_v52 }
 0x2bf   :  { %v880_v29 = vmul.f32 %v864_v46, %v1472_v1 }
 0x2c1   :  { %896 = vst [vmem:[#allocation8 + $0x78] sm:$0xff] %v880_v29 }
 0x2c2   :  { %909 = dma.vmem_to_hbm [thread:$0]  %s902_s29, 2048, %s904_s5, [#allocation4], %s1223_s20, %s1223_s20, %s1224_s21  }
 0x2c3   :  { %1220 = dma.done.wait [#allocation4], 2048  }
 0x2c4   :  { %1221 = vsyncadd [#allocation4], 4294965248 }
 0x2c5   :  { %914 = vsyncpa [#allocation3], 1 }
 0x2c6   :  { %915 = vsyncpa [#allocation6], 1 }
 0x2c7   :  { %916 = vsyncpa [#allocation4], 1 }

</bundles_post_ra>
